<compile_context>
chip_gen: v7x
topology: tpu7x:2x2x1
jax: 0.10.0
libtpu: 0.0.40
codegen_flags: <defaults>
</compile_context>

<pallas_src>
import jax
import jax.numpy as jnp
from jax.experimental import pallas as pl
from jax.experimental.pallas import tpu as pltpu


def realnvp_kernel(x_ref, w1_ref, b1_ref, w2_ref, b2_ref, wst_ref, bst_ref,
                   o_ref):
    """Feature-major RealNVP flow stack on one batch tile.

    x_ref:   [D, TILE_B]           (D = 2 * n_half)
    w1_ref:  [n_flows, n_hidden, n_half]      b1_ref: [n_flows, n_hidden, 1]
    w2_ref:  [n_flows, n_hidden, n_hidden]    b2_ref: [n_flows, n_hidden, 1]
    wst_ref: [n_flows, 2*n_half, n_hidden]    bst_ref:[n_flows, 2*n_half, 1]
    o_ref:   [D + n_half, TILE_B]  rows [0:D) = x_out, rows [D:D+n_half) = ldj
    """
    n_flows = w1_ref.shape[0]
    d = x_ref.shape[0]
    n_half = d // 2

    x_a = x_ref[:n_half, :]           # [n_half, TILE_B]
    x_b = x_ref[n_half:, :]           # [n_half, TILE_B]
    ldj = jnp.zeros((n_half, x_ref.shape[1]), jnp.float32)

    for k in range(n_flows):          # static unroll over flows
        # hidden = relu(W2 @ relu(W1 @ x_a + b1) + b2)   (lane axis = batch)
        h = jnp.maximum(
            jnp.dot(w1_ref[k], x_a, preferred_element_type=jnp.float32)
            + b1_ref[k], 0.0)
        h = jnp.maximum(
            jnp.dot(w2_ref[k], h, preferred_element_type=jnp.float32)
            + b2_ref[k], 0.0)
        # fused s/t head: one matmul -> [2*n_half, TILE_B]
        st = jnp.dot(wst_ref[k], h, preferred_element_type=jnp.float32) + bst_ref[k]
        s = jnp.tanh(st[:n_half, :])
        t = st[n_half:, :]

        # x_b' = exp(s) * x_b + t ; new x = cat([x_b', x_a]) -> split next iter is a swap
        x_b_new = jnp.exp(s) * x_b + t
        x_a, x_b = x_b_new, x_a
        ldj = ldj + s

    # single full-width, lane-dense store: [x_out ; ldj]
    o_ref[...] = jnp.concatenate([x_a, x_b, ldj], axis=0)


def fuse_params(params):
    """PyTorch-shaped params -> kernel layout (fused s/t head, biases as [out, 1])."""
    w1, b1, w2, b2, ws, bs, wt, bt = params
    wst = jnp.concatenate([ws, wt], axis=1)          # [n_flows, 2*n_half, n_hidden]
    bst = jnp.concatenate([bs, bt], axis=1)          # [n_flows, 2*n_half]
    return (w1, b1[..., None], w2, b2[..., None], wst, bst[..., None])


def realnvp_forward(x, params, tile_b=256):
    """Pallas wrapper. x: [B, D]. Returns (x_out [B, D], log_det_jacobian [B, n_half])."""
    w1, b1, w2, b2, wst, bst = fuse_params(params)
    B, D = x.shape
    n_half = D // 2

    # Feature-major: batch on the 128-wide lane axis; pad batch to a tile multiple.
    tile_b = max(128, tile_b)
    b_pad = tile_b * pl.cdiv(B, tile_b)
    x_fm = jnp.transpose(x)                          # [D, B]
    if b_pad != B:
        x_fm = jnp.pad(x_fm, ((0, 0), (0, b_pad - B)))

    grid = (b_pad // tile_b,)
    out_fm = pl.pallas_call(
        realnvp_kernel,
        out_shape=jax.ShapeDtypeStruct((D + n_half, b_pad), jnp.float32),
        grid_spec=pltpu.PrefetchScalarGridSpec(
            num_scalar_prefetch=0,
            grid=grid,
            in_specs=[
                # batch tile: double-buffered / pipelined across grid steps
                pl.BlockSpec((D, tile_b), lambda i: (0, i)),
                # weights/biases: full extent, constant index_map -> VMEM-resident
                pl.BlockSpec(w1.shape, lambda i: (0, 0, 0)),
                pl.BlockSpec(b1.shape, lambda i: (0, 0, 0)),
                pl.BlockSpec(w2.shape, lambda i: (0, 0, 0)),
                pl.BlockSpec(b2.shape, lambda i: (0, 0, 0)),
                pl.BlockSpec(wst.shape, lambda i: (0, 0, 0)),
                pl.BlockSpec(bst.shape, lambda i: (0, 0, 0)),
            ],
            out_specs=pl.BlockSpec((D + n_half, tile_b), lambda i: (0, i)),
        ),
        compiler_params=pltpu.CompilerParams(
            dimension_semantics=("parallel",),          # megacore-split batch on v7x
            vmem_limit_bytes=32 * 1024 * 1024,          # safe on v5e/v6e/v7x
        ),
    )(x_fm, w1, b1, w2, b2, wst, bst)

    x_out = jnp.transpose(out_fm[:D, :B])
    log_det = jnp.transpose(out_fm[D:, :B])
    return x_out, log_det


def make_params(key, n_flows, n_half, n_hidden):
    """Deterministic synthetic parameters in PyTorch nn.Linear shapes ([out, in])."""
    ks = jax.random.split(key, 8)
    scale = 0.1
    w1 = scale * jax.random.normal(ks[0], (n_flows, n_hidden, n_half), jnp.float32)
    b1 = scale * jax.random.normal(ks[1], (n_flows, n_hidden), jnp.float32)
    w2 = scale * jax.random.normal(ks[2], (n_flows, n_hidden, n_hidden), jnp.float32)
    b2 = scale * jax.random.normal(ks[3], (n_flows, n_hidden), jnp.float32)
    ws = scale * jax.random.normal(ks[4], (n_flows, n_half, n_hidden), jnp.float32)
    bs = scale * jax.random.normal(ks[5], (n_flows, n_half), jnp.float32)
    wt = scale * jax.random.normal(ks[6], (n_flows, n_half, n_hidden), jnp.float32)
    bt = scale * jax.random.normal(ks[7], (n_flows, n_half), jnp.float32)
    return (w1, b1, w2, b2, ws, bs, wt, bt)


def realnvp_ref(x, params):
    """Pure-JAX reference mirroring the PyTorch forward exactly (unfused heads)."""
    w1, b1, w2, b2, ws, bs, wt, bt = params
    n_half = x.shape[1] // 2
    ldj = jnp.zeros((x.shape[0], n_half), jnp.float32)
    for k in range(w1.shape[0]):
        x_a = x[:, :n_half]
        x_b = x[:, n_half:]
        h = jax.nn.relu(x_a @ w1[k].T + b1[k])
        h = jax.nn.relu(h @ w2[k].T + b2[k])
        s = jnp.tanh(h @ ws[k].T + bs[k])
        t = h @ wt[k].T + bt[k]
        x_b = jnp.exp(s) * x_b + t
        x = jnp.concatenate([x_b, x_a], axis=1)
        ldj = ldj + s
    return x, ldj


if __name__ == "__main__":
    n_flows = 8
    data_dim = 4          # must be even; n_half = 2
    n_hidden = 32
    batch = 512           # two 256-wide lane-dense batch tiles -> exercises the grid

    key = jax.random.PRNGKey(0)
    k_x, k_p = jax.random.split(key)
    x = jax.random.normal(k_x, (batch, data_dim), jnp.float32)
    params = make_params(k_p, n_flows, data_dim // 2, n_hidden)

    x_out, log_det = realnvp_forward(x, params, tile_b=256)
    jax.block_until_ready((x_out, log_det))

    x_ref, ldj_ref = realnvp_ref(x, params)
    assert jnp.allclose(x_out, x_ref, atol=1e-5, rtol=1e-5)
    assert jnp.allclose(log_det, ldj_ref, atol=1e-5, rtol=1e-5)

    print("KERNEL_OK")
</pallas_src>

<mosaic_0001>
module attributes {stable_mosaic.version = 11 : i64} {
  func.func @realnvp_kernel(%arg0: i32, %arg1: memref<4x256xf32, #tpu.memory_space<vmem>>, %arg2: memref<8x32x2xf32, #tpu.memory_space<vmem>>, %arg3: memref<8x32x1xf32, #tpu.memory_space<vmem>>, %arg4: memref<8x32x32xf32, #tpu.memory_space<vmem>>, %arg5: memref<8x32x1xf32, #tpu.memory_space<vmem>>, %arg6: memref<8x4x32xf32, #tpu.memory_space<vmem>>, %arg7: memref<8x4x1xf32, #tpu.memory_space<vmem>>, %arg8: memref<6x256xf32, #tpu.memory_space<vmem>>) attributes {dimension_semantics = [#tpu.dimension_semantics<parallel>], iteration_bounds = array<i64: 2>, scalar_prefetch = 0 : i64, scratch_operands = 0 : i64, tpu.core_type = #tpu.core_type<tc>, window_params = [{transform_indices = @transform_0, window_bounds = array<i64: 4, 256>}, {pipeline_mode = #tpu.pipeline_mode<synchronous>, transform_indices = @transform_1, window_bounds = array<i64: 8, 32, 2>}, {pipeline_mode = #tpu.pipeline_mode<synchronous>, transform_indices = @transform_2, window_bounds = array<i64: 8, 32, 1>}, {pipeline_mode = #tpu.pipeline_mode<synchronous>, transform_indices = @transform_3, window_bounds = array<i64: 8, 32, 32>}, {pipeline_mode = #tpu.pipeline_mode<synchronous>, transform_indices = @transform_4, window_bounds = array<i64: 8, 32, 1>}, {pipeline_mode = #tpu.pipeline_mode<synchronous>, transform_indices = @transform_5, window_bounds = array<i64: 8, 4, 32>}, {pipeline_mode = #tpu.pipeline_mode<synchronous>, transform_indices = @transform_6, window_bounds = array<i64: 8, 4, 1>}, {transform_indices = @transform_7, window_bounds = array<i64: 6, 256>}]} {
    %c0 = arith.constant 0 : index
    %c0_0 = arith.constant 0 : index
    %0 = vector.load %arg1[%c0, %c0_0] : memref<4x256xf32, #tpu.memory_space<vmem>>, vector<2x256xf32>
    %c2 = arith.constant 2 : index
    %c0_1 = arith.constant 0 : index
    %1 = vector.load %arg1[%c2, %c0_1] : memref<4x256xf32, #tpu.memory_space<vmem>>, vector<2x256xf32>
    %cst = arith.constant 0.000000e+00 : f32
    %2 = vector.broadcast %cst : f32 to vector<2x256xf32>
    %c0_2 = arith.constant 0 : index
    %c0_3 = arith.constant 0 : index
    %c0_4 = arith.constant 0 : index
    %3 = vector.load %arg2[%c0_2, %c0_3, %c0_4] : memref<8x32x2xf32, #tpu.memory_space<vmem>>, vector<1x32x2xf32>
    %4 = vector.shape_cast %3 : vector<1x32x2xf32> to vector<32x2xf32>
    %cst_5 = arith.constant dense<0.000000e+00> : vector<32x256xf32>
    %5 = tpu.matmul %4, %0, %cst_5 {dimension_numbers = #tpu.dot_dimension_numbers<[1], [0], [0], [1], [0, 0, 1, 1], [], []>} : vector<32x2xf32>, vector<2x256xf32>, vector<32x256xf32> -> vector<32x256xf32>
    %c0_6 = arith.constant 0 : index
    %c0_7 = arith.constant 0 : index
    %c0_8 = arith.constant 0 : index
    %6 = vector.load %arg3[%c0_6, %c0_7, %c0_8] : memref<8x32x1xf32, #tpu.memory_space<vmem>>, vector<1x32x1xf32>
    %7 = vector.shape_cast %6 : vector<1x32x1xf32> to vector<32x1xf32>
    %8 = vector.broadcast %7 : vector<32x1xf32> to vector<32x256xf32>
    %9 = arith.addf %5, %8 : vector<32x256xf32>
    %cst_9 = arith.constant 0.000000e+00 : f32
    %10 = vector.broadcast %cst_9 : f32 to vector<32x256xf32>
    %11 = arith.maximumf %9, %10 : vector<32x256xf32>
    %c0_10 = arith.constant 0 : index
    %c0_11 = arith.constant 0 : index
    %c0_12 = arith.constant 0 : index
    %12 = vector.load %arg4[%c0_10, %c0_11, %c0_12] : memref<8x32x32xf32, #tpu.memory_space<vmem>>, vector<1x32x32xf32>
    %13 = vector.shape_cast %12 : vector<1x32x32xf32> to vector<32x32xf32>
    %cst_13 = arith.constant dense<0.000000e+00> : vector<32x256xf32>
    %14 = tpu.matmul %13, %11, %cst_13 {dimension_numbers = #tpu.dot_dimension_numbers<[1], [0], [0], [1], [0, 0, 1, 1], [], []>} : vector<32x32xf32>, vector<32x256xf32>, vector<32x256xf32> -> vector<32x256xf32>
    %c0_14 = arith.constant 0 : index
    %c0_15 = arith.constant 0 : index
    %c0_16 = arith.constant 0 : index
    %15 = vector.load %arg5[%c0_14, %c0_15, %c0_16] : memref<8x32x1xf32, #tpu.memory_space<vmem>>, vector<1x32x1xf32>
    %16 = vector.shape_cast %15 : vector<1x32x1xf32> to vector<32x1xf32>
    %17 = vector.broadcast %16 : vector<32x1xf32> to vector<32x256xf32>
    %18 = arith.addf %14, %17 : vector<32x256xf32>
    %cst_17 = arith.constant 0.000000e+00 : f32
    %19 = vector.broadcast %cst_17 : f32 to vector<32x256xf32>
    %20 = arith.maximumf %18, %19 : vector<32x256xf32>
    %c0_18 = arith.constant 0 : index
    %c0_19 = arith.constant 0 : index
    %c0_20 = arith.constant 0 : index
    %21 = vector.load %arg6[%c0_18, %c0_19, %c0_20] : memref<8x4x32xf32, #tpu.memory_space<vmem>>, vector<1x4x32xf32>
    %22 = vector.shape_cast %21 : vector<1x4x32xf32> to vector<4x32xf32>
    %cst_21 = arith.constant dense<0.000000e+00> : vector<4x256xf32>
    %23 = tpu.matmul %22, %20, %cst_21 {dimension_numbers = #tpu.dot_dimension_numbers<[1], [0], [0], [1], [0, 0, 1, 1], [], []>} : vector<4x32xf32>, vector<32x256xf32>, vector<4x256xf32> -> vector<4x256xf32>
    %c0_22 = arith.constant 0 : index
    %c0_23 = arith.constant 0 : index
    %c0_24 = arith.constant 0 : index
    %24 = vector.load %arg7[%c0_22, %c0_23, %c0_24] : memref<8x4x1xf32, #tpu.memory_space<vmem>>, vector<1x4x1xf32>
    %25 = vector.shape_cast %24 : vector<1x4x1xf32> to vector<4x1xf32>
    %26 = vector.broadcast %25 : vector<4x1xf32> to vector<4x256xf32>
    %27 = arith.addf %23, %26 : vector<4x256xf32>
    %28 = vector.extract_strided_slice %27 {offsets = [0, 0], sizes = [2, 256], strides = [1, 1]} : vector<4x256xf32> to vector<2x256xf32>
    %29 = math.tanh %28 : vector<2x256xf32>
    %30 = vector.extract_strided_slice %27 {offsets = [2, 0], sizes = [2, 256], strides = [1, 1]} : vector<4x256xf32> to vector<2x256xf32>
    %31 = math.exp %29 : vector<2x256xf32>
    %32 = arith.mulf %31, %1 : vector<2x256xf32>
    %33 = arith.addf %32, %30 : vector<2x256xf32>
    %34 = arith.addf %2, %29 : vector<2x256xf32>
    %c1 = arith.constant 1 : index
    %c0_25 = arith.constant 0 : index
    %c0_26 = arith.constant 0 : index
    %35 = vector.load %arg2[%c1, %c0_25, %c0_26] : memref<8x32x2xf32, #tpu.memory_space<vmem>>, vector<1x32x2xf32>
    %36 = vector.shape_cast %35 : vector<1x32x2xf32> to vector<32x2xf32>
    %cst_27 = arith.constant dense<0.000000e+00> : vector<32x256xf32>
    %37 = tpu.matmul %36, %33, %cst_27 {dimension_numbers = #tpu.dot_dimension_numbers<[1], [0], [0], [1], [0, 0, 1, 1], [], []>} : vector<32x2xf32>, vector<2x256xf32>, vector<32x256xf32> -> vector<32x256xf32>
    %c1_28 = arith.constant 1 : index
    %c0_29 = arith.constant 0 : index
    %c0_30 = arith.constant 0 : index
    %38 = vector.load %arg3[%c1_28, %c0_29, %c0_30] : memref<8x32x1xf32, #tpu.memory_space<vmem>>, vector<1x32x1xf32>
    %39 = vector.shape_cast %38 : vector<1x32x1xf32> to vector<32x1xf32>
    %40 = vector.broadcast %39 : vector<32x1xf32> to vector<32x256xf32>
    %41 = arith.addf %37, %40 : vector<32x256xf32>
    %cst_31 = arith.constant 0.000000e+00 : f32
    %42 = vector.broadcast %cst_31 : f32 to vector<32x256xf32>
    %43 = arith.maximumf %41, %42 : vector<32x256xf32>
    %c1_32 = arith.constant 1 : index
    %c0_33 = arith.constant 0 : index
    %c0_34 = arith.constant 0 : index
    %44 = vector.load %arg4[%c1_32, %c0_33, %c0_34] : memref<8x32x32xf32, #tpu.memory_space<vmem>>, vector<1x32x32xf32>
    %45 = vector.shape_cast %44 : vector<1x32x32xf32> to vector<32x32xf32>
    %cst_35 = arith.constant dense<0.000000e+00> : vector<32x256xf32>
    %46 = tpu.matmul %45, %43, %cst_35 {dimension_numbers = #tpu.dot_dimension_numbers<[1], [0], [0], [1], [0, 0, 1, 1], [], []>} : vector<32x32xf32>, vector<32x256xf32>, vector<32x256xf32> -> vector<32x256xf32>
    %c1_36 = arith.constant 1 : index
    %c0_37 = arith.constant 0 : index
    %c0_38 = arith.constant 0 : index
    %47 = vector.load %arg5[%c1_36, %c0_37, %c0_38] : memref<8x32x1xf32, #tpu.memory_space<vmem>>, vector<1x32x1xf32>
    %48 = vector.shape_cast %47 : vector<1x32x1xf32> to vector<32x1xf32>
    %49 = vector.broadcast %48 : vector<32x1xf32> to vector<32x256xf32>
    %50 = arith.addf %46, %49 : vector<32x256xf32>
    %cst_39 = arith.constant 0.000000e+00 : f32
    %51 = vector.broadcast %cst_39 : f32 to vector<32x256xf32>
    %52 = arith.maximumf %50, %51 : vector<32x256xf32>
    %c1_40 = arith.constant 1 : index
    %c0_41 = arith.constant 0 : index
    %c0_42 = arith.constant 0 : index
    %53 = vector.load %arg6[%c1_40, %c0_41, %c0_42] : memref<8x4x32xf32, #tpu.memory_space<vmem>>, vector<1x4x32xf32>
    %54 = vector.shape_cast %53 : vector<1x4x32xf32> to vector<4x32xf32>
    %cst_43 = arith.constant dense<0.000000e+00> : vector<4x256xf32>
    %55 = tpu.matmul %54, %52, %cst_43 {dimension_numbers = #tpu.dot_dimension_numbers<[1], [0], [0], [1], [0, 0, 1, 1], [], []>} : vector<4x32xf32>, vector<32x256xf32>, vector<4x256xf32> -> vector<4x256xf32>
    %c1_44 = arith.constant 1 : index
    %c0_45 = arith.constant 0 : index
    %c0_46 = arith.constant 0 : index
    %56 = vector.load %arg7[%c1_44, %c0_45, %c0_46] : memref<8x4x1xf32, #tpu.memory_space<vmem>>, vector<1x4x1xf32>
    %57 = vector.shape_cast %56 : vector<1x4x1xf32> to vector<4x1xf32>
    %58 = vector.broadcast %57 : vector<4x1xf32> to vector<4x256xf32>
    %59 = arith.addf %55, %58 : vector<4x256xf32>
    %60 = vector.extract_strided_slice %59 {offsets = [0, 0], sizes = [2, 256], strides = [1, 1]} : vector<4x256xf32> to vector<2x256xf32>
    %61 = math.tanh %60 : vector<2x256xf32>
    %62 = vector.extract_strided_slice %59 {offsets = [2, 0], sizes = [2, 256], strides = [1, 1]} : vector<4x256xf32> to vector<2x256xf32>
    %63 = math.exp %61 : vector<2x256xf32>
    %64 = arith.mulf %63, %0 : vector<2x256xf32>
    %65 = arith.addf %64, %62 : vector<2x256xf32>
    %66 = arith.addf %34, %61 : vector<2x256xf32>
    %c2_47 = arith.constant 2 : index
    %c0_48 = arith.constant 0 : index
    %c0_49 = arith.constant 0 : index
    %67 = vector.load %arg2[%c2_47, %c0_48, %c0_49] : memref<8x32x2xf32, #tpu.memory_space<vmem>>, vector<1x32x2xf32>
    %68 = vector.shape_cast %67 : vector<1x32x2xf32> to vector<32x2xf32>
    %cst_50 = arith.constant dense<0.000000e+00> : vector<32x256xf32>
    %69 = tpu.matmul %68, %65, %cst_50 {dimension_numbers = #tpu.dot_dimension_numbers<[1], [0], [0], [1], [0, 0, 1, 1], [], []>} : vector<32x2xf32>, vector<2x256xf32>, vector<32x256xf32> -> vector<32x256xf32>
    %c2_51 = arith.constant 2 : index
    %c0_52 = arith.constant 0 : index
    %c0_53 = arith.constant 0 : index
    %70 = vector.load %arg3[%c2_51, %c0_52, %c0_53] : memref<8x32x1xf32, #tpu.memory_space<vmem>>, vector<1x32x1xf32>
    %71 = vector.shape_cast %70 : vector<1x32x1xf32> to vector<32x1xf32>
    %72 = vector.broadcast %71 : vector<32x1xf32> to vector<32x256xf32>
    %73 = arith.addf %69, %72 : vector<32x256xf32>
    %cst_54 = arith.constant 0.000000e+00 : f32
    %74 = vector.broadcast %cst_54 : f32 to vector<32x256xf32>
    %75 = arith.maximumf %73, %74 : vector<32x256xf32>
    %c2_55 = arith.constant 2 : index
    %c0_56 = arith.constant 0 : index
    %c0_57 = arith.constant 0 : index
    %76 = vector.load %arg4[%c2_55, %c0_56, %c0_57] : memref<8x32x32xf32, #tpu.memory_space<vmem>>, vector<1x32x32xf32>
    %77 = vector.shape_cast %76 : vector<1x32x32xf32> to vector<32x32xf32>
    %cst_58 = arith.constant dense<0.000000e+00> : vector<32x256xf32>
    %78 = tpu.matmul %77, %75, %cst_58 {dimension_numbers = #tpu.dot_dimension_numbers<[1], [0], [0], [1], [0, 0, 1, 1], [], []>} : vector<32x32xf32>, vector<32x256xf32>, vector<32x256xf32> -> vector<32x256xf32>
    %c2_59 = arith.constant 2 : index
    %c0_60 = arith.constant 0 : index
    %c0_61 = arith.constant 0 : index
    %79 = vector.load %arg5[%c2_59, %c0_60, %c0_61] : memref<8x32x1xf32, #tpu.memory_space<vmem>>, vector<1x32x1xf32>
    %80 = vector.shape_cast %79 : vector<1x32x1xf32> to vector<32x1xf32>
    %81 = vector.broadcast %80 : vector<32x1xf32> to vector<32x256xf32>
    %82 = arith.addf %78, %81 : vector<32x256xf32>
    %cst_62 = arith.constant 0.000000e+00 : f32
    %83 = vector.broadcast %cst_62 : f32 to vector<32x256xf32>
    %84 = arith.maximumf %82, %83 : vector<32x256xf32>
    %c2_63 = arith.constant 2 : index
    %c0_64 = arith.constant 0 : index
    %c0_65 = arith.constant 0 : index
    %85 = vector.load %arg6[%c2_63, %c0_64, %c0_65] : memref<8x4x32xf32, #tpu.memory_space<vmem>>, vector<1x4x32xf32>
    %86 = vector.shape_cast %85 : vector<1x4x32xf32> to vector<4x32xf32>
    %cst_66 = arith.constant dense<0.000000e+00> : vector<4x256xf32>
    %87 = tpu.matmul %86, %84, %cst_66 {dimension_numbers = #tpu.dot_dimension_numbers<[1], [0], [0], [1], [0, 0, 1, 1], [], []>} : vector<4x32xf32>, vector<32x256xf32>, vector<4x256xf32> -> vector<4x256xf32>
    %c2_67 = arith.constant 2 : index
    %c0_68 = arith.constant 0 : index
    %c0_69 = arith.constant 0 : index
    %88 = vector.load %arg7[%c2_67, %c0_68, %c0_69] : memref<8x4x1xf32, #tpu.memory_space<vmem>>, vector<1x4x1xf32>
    %89 = vector.shape_cast %88 : vector<1x4x1xf32> to vector<4x1xf32>
    %90 = vector.broadcast %89 : vector<4x1xf32> to vector<4x256xf32>
    %91 = arith.addf %87, %90 : vector<4x256xf32>
    %92 = vector.extract_strided_slice %91 {offsets = [0, 0], sizes = [2, 256], strides = [1, 1]} : vector<4x256xf32> to vector<2x256xf32>
    %93 = math.tanh %92 : vector<2x256xf32>
    %94 = vector.extract_strided_slice %91 {offsets = [2, 0], sizes = [2, 256], strides = [1, 1]} : vector<4x256xf32> to vector<2x256xf32>
    %95 = math.exp %93 : vector<2x256xf32>
    %96 = arith.mulf %95, %33 : vector<2x256xf32>
    %97 = arith.addf %96, %94 : vector<2x256xf32>
    %98 = arith.addf %66, %93 : vector<2x256xf32>
    %c3 = arith.constant 3 : index
    %c0_70 = arith.constant 0 : index
    %c0_71 = arith.constant 0 : index
    %99 = vector.load %arg2[%c3, %c0_70, %c0_71] : memref<8x32x2xf32, #tpu.memory_space<vmem>>, vector<1x32x2xf32>
    %100 = vector.shape_cast %99 : vector<1x32x2xf32> to vector<32x2xf32>
    %cst_72 = arith.constant dense<0.000000e+00> : vector<32x256xf32>
    %101 = tpu.matmul %100, %97, %cst_72 {dimension_numbers = #tpu.dot_dimension_numbers<[1], [0], [0], [1], [0, 0, 1, 1], [], []>} : vector<32x2xf32>, vector<2x256xf32>, vector<32x256xf32> -> vector<32x256xf32>
    %c3_73 = arith.constant 3 : index
    %c0_74 = arith.constant 0 : index
    %c0_75 = arith.constant 0 : index
    %102 = vector.load %arg3[%c3_73, %c0_74, %c0_75] : memref<8x32x1xf32, #tpu.memory_space<vmem>>, vector<1x32x1xf32>
    %103 = vector.shape_cast %102 : vector<1x32x1xf32> to vector<32x1xf32>
    %104 = vector.broadcast %103 : vector<32x1xf32> to vector<32x256xf32>
    %105 = arith.addf %101, %104 : vector<32x256xf32>
    %cst_76 = arith.constant 0.000000e+00 : f32
    %106 = vector.broadcast %cst_76 : f32 to vector<32x256xf32>
    %107 = arith.maximumf %105, %106 : vector<32x256xf32>
    %c3_77 = arith.constant 3 : index
    %c0_78 = arith.constant 0 : index
    %c0_79 = arith.constant 0 : index
    %108 = vector.load %arg4[%c3_77, %c0_78, %c0_79] : memref<8x32x32xf32, #tpu.memory_space<vmem>>, vector<1x32x32xf32>
    %109 = vector.shape_cast %108 : vector<1x32x32xf32> to vector<32x32xf32>
    %cst_80 = arith.constant dense<0.000000e+00> : vector<32x256xf32>
    %110 = tpu.matmul %109, %107, %cst_80 {dimension_numbers = #tpu.dot_dimension_numbers<[1], [0], [0], [1], [0, 0, 1, 1], [], []>} : vector<32x32xf32>, vector<32x256xf32>, vector<32x256xf32> -> vector<32x256xf32>
    %c3_81 = arith.constant 3 : index
    %c0_82 = arith.constant 0 : index
    %c0_83 = arith.constant 0 : index
    %111 = vector.load %arg5[%c3_81, %c0_82, %c0_83] : memref<8x32x1xf32, #tpu.memory_space<vmem>>, vector<1x32x1xf32>
    %112 = vector.shape_cast %111 : vector<1x32x1xf32> to vector<32x1xf32>
    %113 = vector.broadcast %112 : vector<32x1xf32> to vector<32x256xf32>
    %114 = arith.addf %110, %113 : vector<32x256xf32>
    %cst_84 = arith.constant 0.000000e+00 : f32
    %115 = vector.broadcast %cst_84 : f32 to vector<32x256xf32>
    %116 = arith.maximumf %114, %115 : vector<32x256xf32>
    %c3_85 = arith.constant 3 : index
    %c0_86 = arith.constant 0 : index
    %c0_87 = arith.constant 0 : index
    %117 = vector.load %arg6[%c3_85, %c0_86, %c0_87] : memref<8x4x32xf32, #tpu.memory_space<vmem>>, vector<1x4x32xf32>
    %118 = vector.shape_cast %117 : vector<1x4x32xf32> to vector<4x32xf32>
    %cst_88 = arith.constant dense<0.000000e+00> : vector<4x256xf32>
    %119 = tpu.matmul %118, %116, %cst_88 {dimension_numbers = #tpu.dot_dimension_numbers<[1], [0], [0], [1], [0, 0, 1, 1], [], []>} : vector<4x32xf32>, vector<32x256xf32>, vector<4x256xf32> -> vector<4x256xf32>
    %c3_89 = arith.constant 3 : index
    %c0_90 = arith.constant 0 : index
    %c0_91 = arith.constant 0 : index
    %120 = vector.load %arg7[%c3_89, %c0_90, %c0_91] : memref<8x4x1xf32, #tpu.memory_space<vmem>>, vector<1x4x1xf32>
    %121 = vector.shape_cast %120 : vector<1x4x1xf32> to vector<4x1xf32>
    %122 = vector.broadcast %121 : vector<4x1xf32> to vector<4x256xf32>
    %123 = arith.addf %119, %122 : vector<4x256xf32>
    %124 = vector.extract_strided_slice %123 {offsets = [0, 0], sizes = [2, 256], strides = [1, 1]} : vector<4x256xf32> to vector<2x256xf32>
    %125 = math.tanh %124 : vector<2x256xf32>
    %126 = vector.extract_strided_slice %123 {offsets = [2, 0], sizes = [2, 256], strides = [1, 1]} : vector<4x256xf32> to vector<2x256xf32>
    %127 = math.exp %125 : vector<2x256xf32>
    %128 = arith.mulf %127, %65 : vector<2x256xf32>
    %129 = arith.addf %128, %126 : vector<2x256xf32>
    %130 = arith.addf %98, %125 : vector<2x256xf32>
    %c4 = arith.constant 4 : index
    %c0_92 = arith.constant 0 : index
    %c0_93 = arith.constant 0 : index
    %131 = vector.load %arg2[%c4, %c0_92, %c0_93] : memref<8x32x2xf32, #tpu.memory_space<vmem>>, vector<1x32x2xf32>
    %132 = vector.shape_cast %131 : vector<1x32x2xf32> to vector<32x2xf32>
    %cst_94 = arith.constant dense<0.000000e+00> : vector<32x256xf32>
    %133 = tpu.matmul %132, %129, %cst_94 {dimension_numbers = #tpu.dot_dimension_numbers<[1], [0], [0], [1], [0, 0, 1, 1], [], []>} : vector<32x2xf32>, vector<2x256xf32>, vector<32x256xf32> -> vector<32x256xf32>
    %c4_95 = arith.constant 4 : index
    %c0_96 = arith.constant 0 : index
    %c0_97 = arith.constant 0 : index
    %134 = vector.load %arg3[%c4_95, %c0_96, %c0_97] : memref<8x32x1xf32, #tpu.memory_space<vmem>>, vector<1x32x1xf32>
    %135 = vector.shape_cast %134 : vector<1x32x1xf32> to vector<32x1xf32>
    %136 = vector.broadcast %135 : vector<32x1xf32> to vector<32x256xf32>
    %137 = arith.addf %133, %136 : vector<32x256xf32>
    %cst_98 = arith.constant 0.000000e+00 : f32
    %138 = vector.broadcast %cst_98 : f32 to vector<32x256xf32>
    %139 = arith.maximumf %137, %138 : vector<32x256xf32>
    %c4_99 = arith.constant 4 : index
    %c0_100 = arith.constant 0 : index
    %c0_101 = arith.constant 0 : index
    %140 = vector.load %arg4[%c4_99, %c0_100, %c0_101] : memref<8x32x32xf32, #tpu.memory_space<vmem>>, vector<1x32x32xf32>
    %141 = vector.shape_cast %140 : vector<1x32x32xf32> to vector<32x32xf32>
    %cst_102 = arith.constant dense<0.000000e+00> : vector<32x256xf32>
    %142 = tpu.matmul %141, %139, %cst_102 {dimension_numbers = #tpu.dot_dimension_numbers<[1], [0], [0], [1], [0, 0, 1, 1], [], []>} : vector<32x32xf32>, vector<32x256xf32>, vector<32x256xf32> -> vector<32x256xf32>
    %c4_103 = arith.constant 4 : index
    %c0_104 = arith.constant 0 : index
    %c0_105 = arith.constant 0 : index
    %143 = vector.load %arg5[%c4_103, %c0_104, %c0_105] : memref<8x32x1xf32, #tpu.memory_space<vmem>>, vector<1x32x1xf32>
    %144 = vector.shape_cast %143 : vector<1x32x1xf32> to vector<32x1xf32>
    %145 = vector.broadcast %144 : vector<32x1xf32> to vector<32x256xf32>
    %146 = arith.addf %142, %145 : vector<32x256xf32>
    %cst_106 = arith.constant 0.000000e+00 : f32
    %147 = vector.broadcast %cst_106 : f32 to vector<32x256xf32>
    %148 = arith.maximumf %146, %147 : vector<32x256xf32>
    %c4_107 = arith.constant 4 : index
    %c0_108 = arith.constant 0 : index
    %c0_109 = arith.constant 0 : index
    %149 = vector.load %arg6[%c4_107, %c0_108, %c0_109] : memref<8x4x32xf32, #tpu.memory_space<vmem>>, vector<1x4x32xf32>
    %150 = vector.shape_cast %149 : vector<1x4x32xf32> to vector<4x32xf32>
    %cst_110 = arith.constant dense<0.000000e+00> : vector<4x256xf32>
    %151 = tpu.matmul %150, %148, %cst_110 {dimension_numbers = #tpu.dot_dimension_numbers<[1], [0], [0], [1], [0, 0, 1, 1], [], []>} : vector<4x32xf32>, vector<32x256xf32>, vector<4x256xf32> -> vector<4x256xf32>
    %c4_111 = arith.constant 4 : index
    %c0_112 = arith.constant 0 : index
    %c0_113 = arith.constant 0 : index
    %152 = vector.load %arg7[%c4_111, %c0_112, %c0_113] : memref<8x4x1xf32, #tpu.memory_space<vmem>>, vector<1x4x1xf32>
    %153 = vector.shape_cast %152 : vector<1x4x1xf32> to vector<4x1xf32>
    %154 = vector.broadcast %153 : vector<4x1xf32> to vector<4x256xf32>
    %155 = arith.addf %151, %154 : vector<4x256xf32>
    %156 = vector.extract_strided_slice %155 {offsets = [0, 0], sizes = [2, 256], strides = [1, 1]} : vector<4x256xf32> to vector<2x256xf32>
    %157 = math.tanh %156 : vector<2x256xf32>
    %158 = vector.extract_strided_slice %155 {offsets = [2, 0], sizes = [2, 256], strides = [1, 1]} : vector<4x256xf32> to vector<2x256xf32>
    %159 = math.exp %157 : vector<2x256xf32>
    %160 = arith.mulf %159, %97 : vector<2x256xf32>
    %161 = arith.addf %160, %158 : vector<2x256xf32>
    %162 = arith.addf %130, %157 : vector<2x256xf32>
    %c5 = arith.constant 5 : index
    %c0_114 = arith.constant 0 : index
    %c0_115 = arith.constant 0 : index
    %163 = vector.load %arg2[%c5, %c0_114, %c0_115] : memref<8x32x2xf32, #tpu.memory_space<vmem>>, vector<1x32x2xf32>
    %164 = vector.shape_cast %163 : vector<1x32x2xf32> to vector<32x2xf32>
    %cst_116 = arith.constant dense<0.000000e+00> : vector<32x256xf32>
    %165 = tpu.matmul %164, %161, %cst_116 {dimension_numbers = #tpu.dot_dimension_numbers<[1], [0], [0], [1], [0, 0, 1, 1], [], []>} : vector<32x2xf32>, vector<2x256xf32>, vector<32x256xf32> -> vector<32x256xf32>
    %c5_117 = arith.constant 5 : index
    %c0_118 = arith.constant 0 : index
    %c0_119 = arith.constant 0 : index
    %166 = vector.load %arg3[%c5_117, %c0_118, %c0_119] : memref<8x32x1xf32, #tpu.memory_space<vmem>>, vector<1x32x1xf32>
    %167 = vector.shape_cast %166 : vector<1x32x1xf32> to vector<32x1xf32>
    %168 = vector.broadcast %167 : vector<32x1xf32> to vector<32x256xf32>
    %169 = arith.addf %165, %168 : vector<32x256xf32>
    %cst_120 = arith.constant 0.000000e+00 : f32
    %170 = vector.broadcast %cst_120 : f32 to vector<32x256xf32>
    %171 = arith.maximumf %169, %170 : vector<32x256xf32>
    %c5_121 = arith.constant 5 : index
    %c0_122 = arith.constant 0 : index
    %c0_123 = arith.constant 0 : index
    %172 = vector.load %arg4[%c5_121, %c0_122, %c0_123] : memref<8x32x32xf32, #tpu.memory_space<vmem>>, vector<1x32x32xf32>
    %173 = vector.shape_cast %172 : vector<1x32x32xf32> to vector<32x32xf32>
    %cst_124 = arith.constant dense<0.000000e+00> : vector<32x256xf32>
    %174 = tpu.matmul %173, %171, %cst_124 {dimension_numbers = #tpu.dot_dimension_numbers<[1], [0], [0], [1], [0, 0, 1, 1], [], []>} : vector<32x32xf32>, vector<32x256xf32>, vector<32x256xf32> -> vector<32x256xf32>
    %c5_125 = arith.constant 5 : index
    %c0_126 = arith.constant 0 : index
    %c0_127 = arith.constant 0 : index
    %175 = vector.load %arg5[%c5_125, %c0_126, %c0_127] : memref<8x32x1xf32, #tpu.memory_space<vmem>>, vector<1x32x1xf32>
    %176 = vector.shape_cast %175 : vector<1x32x1xf32> to vector<32x1xf32>
    %177 = vector.broadcast %176 : vector<32x1xf32> to vector<32x256xf32>
    %178 = arith.addf %174, %177 : vector<32x256xf32>
    %cst_128 = arith.constant 0.000000e+00 : f32
    %179 = vector.broadcast %cst_128 : f32 to vector<32x256xf32>
    %180 = arith.maximumf %178, %179 : vector<32x256xf32>
    %c5_129 = arith.constant 5 : index
    %c0_130 = arith.constant 0 : index
    %c0_131 = arith.constant 0 : index
    %181 = vector.load %arg6[%c5_129, %c0_130, %c0_131] : memref<8x4x32xf32, #tpu.memory_space<vmem>>, vector<1x4x32xf32>
    %182 = vector.shape_cast %181 : vector<1x4x32xf32> to vector<4x32xf32>
    %cst_132 = arith.constant dense<0.000000e+00> : vector<4x256xf32>
    %183 = tpu.matmul %182, %180, %cst_132 {dimension_numbers = #tpu.dot_dimension_numbers<[1], [0], [0], [1], [0, 0, 1, 1], [], []>} : vector<4x32xf32>, vector<32x256xf32>, vector<4x256xf32> -> vector<4x256xf32>
    %c5_133 = arith.constant 5 : index
    %c0_134 = arith.constant 0 : index
    %c0_135 = arith.constant 0 : index
    %184 = vector.load %arg7[%c5_133, %c0_134, %c0_135] : memref<8x4x1xf32, #tpu.memory_space<vmem>>, vector<1x4x1xf32>
    %185 = vector.shape_cast %184 : vector<1x4x1xf32> to vector<4x1xf32>
    %186 = vector.broadcast %185 : vector<4x1xf32> to vector<4x256xf32>
    %187 = arith.addf %183, %186 : vector<4x256xf32>
    %188 = vector.extract_strided_slice %187 {offsets = [0, 0], sizes = [2, 256], strides = [1, 1]} : vector<4x256xf32> to vector<2x256xf32>
    %189 = math.tanh %188 : vector<2x256xf32>
    %190 = vector.extract_strided_slice %187 {offsets = [2, 0], sizes = [2, 256], strides = [1, 1]} : vector<4x256xf32> to vector<2x256xf32>
    %191 = math.exp %189 : vector<2x256xf32>
    %192 = arith.mulf %191, %129 : vector<2x256xf32>
    %193 = arith.addf %192, %190 : vector<2x256xf32>
    %194 = arith.addf %162, %189 : vector<2x256xf32>
    %c6 = arith.constant 6 : index
    %c0_136 = arith.constant 0 : index
    %c0_137 = arith.constant 0 : index
    %195 = vector.load %arg2[%c6, %c0_136, %c0_137] : memref<8x32x2xf32, #tpu.memory_space<vmem>>, vector<1x32x2xf32>
    %196 = vector.shape_cast %195 : vector<1x32x2xf32> to vector<32x2xf32>
    %cst_138 = arith.constant dense<0.000000e+00> : vector<32x256xf32>
    %197 = tpu.matmul %196, %193, %cst_138 {dimension_numbers = #tpu.dot_dimension_numbers<[1], [0], [0], [1], [0, 0, 1, 1], [], []>} : vector<32x2xf32>, vector<2x256xf32>, vector<32x256xf32> -> vector<32x256xf32>
    %c6_139 = arith.constant 6 : index
    %c0_140 = arith.constant 0 : index
    %c0_141 = arith.constant 0 : index
    %198 = vector.load %arg3[%c6_139, %c0_140, %c0_141] : memref<8x32x1xf32, #tpu.memory_space<vmem>>, vector<1x32x1xf32>
    %199 = vector.shape_cast %198 : vector<1x32x1xf32> to vector<32x1xf32>
    %200 = vector.broadcast %199 : vector<32x1xf32> to vector<32x256xf32>
    %201 = arith.addf %197, %200 : vector<32x256xf32>
    %cst_142 = arith.constant 0.000000e+00 : f32
    %202 = vector.broadcast %cst_142 : f32 to vector<32x256xf32>
    %203 = arith.maximumf %201, %202 : vector<32x256xf32>
    %c6_143 = arith.constant 6 : index
    %c0_144 = arith.constant 0 : index
    %c0_145 = arith.constant 0 : index
    %204 = vector.load %arg4[%c6_143, %c0_144, %c0_145] : memref<8x32x32xf32, #tpu.memory_space<vmem>>, vector<1x32x32xf32>
    %205 = vector.shape_cast %204 : vector<1x32x32xf32> to vector<32x32xf32>
    %cst_146 = arith.constant dense<0.000000e+00> : vector<32x256xf32>
    %206 = tpu.matmul %205, %203, %cst_146 {dimension_numbers = #tpu.dot_dimension_numbers<[1], [0], [0], [1], [0, 0, 1, 1], [], []>} : vector<32x32xf32>, vector<32x256xf32>, vector<32x256xf32> -> vector<32x256xf32>
    %c6_147 = arith.constant 6 : index
    %c0_148 = arith.constant 0 : index
    %c0_149 = arith.constant 0 : index
    %207 = vector.load %arg5[%c6_147, %c0_148, %c0_149] : memref<8x32x1xf32, #tpu.memory_space<vmem>>, vector<1x32x1xf32>
    %208 = vector.shape_cast %207 : vector<1x32x1xf32> to vector<32x1xf32>
    %209 = vector.broadcast %208 : vector<32x1xf32> to vector<32x256xf32>
    %210 = arith.addf %206, %209 : vector<32x256xf32>
    %cst_150 = arith.constant 0.000000e+00 : f32
    %211 = vector.broadcast %cst_150 : f32 to vector<32x256xf32>
    %212 = arith.maximumf %210, %211 : vector<32x256xf32>
    %c6_151 = arith.constant 6 : index
    %c0_152 = arith.constant 0 : index
    %c0_153 = arith.constant 0 : index
    %213 = vector.load %arg6[%c6_151, %c0_152, %c0_153] : memref<8x4x32xf32, #tpu.memory_space<vmem>>, vector<1x4x32xf32>
    %214 = vector.shape_cast %213 : vector<1x4x32xf32> to vector<4x32xf32>
    %cst_154 = arith.constant dense<0.000000e+00> : vector<4x256xf32>
    %215 = tpu.matmul %214, %212, %cst_154 {dimension_numbers = #tpu.dot_dimension_numbers<[1], [0], [0], [1], [0, 0, 1, 1], [], []>} : vector<4x32xf32>, vector<32x256xf32>, vector<4x256xf32> -> vector<4x256xf32>
    %c6_155 = arith.constant 6 : index
    %c0_156 = arith.constant 0 : index
    %c0_157 = arith.constant 0 : index
    %216 = vector.load %arg7[%c6_155, %c0_156, %c0_157] : memref<8x4x1xf32, #tpu.memory_space<vmem>>, vector<1x4x1xf32>
    %217 = vector.shape_cast %216 : vector<1x4x1xf32> to vector<4x1xf32>
    %218 = vector.broadcast %217 : vector<4x1xf32> to vector<4x256xf32>
    %219 = arith.addf %215, %218 : vector<4x256xf32>
    %220 = vector.extract_strided_slice %219 {offsets = [0, 0], sizes = [2, 256], strides = [1, 1]} : vector<4x256xf32> to vector<2x256xf32>
    %221 = math.tanh %220 : vector<2x256xf32>
    %222 = vector.extract_strided_slice %219 {offsets = [2, 0], sizes = [2, 256], strides = [1, 1]} : vector<4x256xf32> to vector<2x256xf32>
    %223 = math.exp %221 : vector<2x256xf32>
    %224 = arith.mulf %223, %161 : vector<2x256xf32>
    %225 = arith.addf %224, %222 : vector<2x256xf32>
    %226 = arith.addf %194, %221 : vector<2x256xf32>
    %c7 = arith.constant 7 : index
    %c0_158 = arith.constant 0 : index
    %c0_159 = arith.constant 0 : index
    %227 = vector.load %arg2[%c7, %c0_158, %c0_159] : memref<8x32x2xf32, #tpu.memory_space<vmem>>, vector<1x32x2xf32>
    %228 = vector.shape_cast %227 : vector<1x32x2xf32> to vector<32x2xf32>
    %cst_160 = arith.constant dense<0.000000e+00> : vector<32x256xf32>
    %229 = tpu.matmul %228, %225, %cst_160 {dimension_numbers = #tpu.dot_dimension_numbers<[1], [0], [0], [1], [0, 0, 1, 1], [], []>} : vector<32x2xf32>, vector<2x256xf32>, vector<32x256xf32> -> vector<32x256xf32>
    %c7_161 = arith.constant 7 : index
    %c0_162 = arith.constant 0 : index
    %c0_163 = arith.constant 0 : index
    %230 = vector.load %arg3[%c7_161, %c0_162, %c0_163] : memref<8x32x1xf32, #tpu.memory_space<vmem>>, vector<1x32x1xf32>
    %231 = vector.shape_cast %230 : vector<1x32x1xf32> to vector<32x1xf32>
    %232 = vector.broadcast %231 : vector<32x1xf32> to vector<32x256xf32>
    %233 = arith.addf %229, %232 : vector<32x256xf32>
    %cst_164 = arith.constant 0.000000e+00 : f32
    %234 = vector.broadcast %cst_164 : f32 to vector<32x256xf32>
    %235 = arith.maximumf %233, %234 : vector<32x256xf32>
    %c7_165 = arith.constant 7 : index
    %c0_166 = arith.constant 0 : index
    %c0_167 = arith.constant 0 : index
    %236 = vector.load %arg4[%c7_165, %c0_166, %c0_167] : memref<8x32x32xf32, #tpu.memory_space<vmem>>, vector<1x32x32xf32>
    %237 = vector.shape_cast %236 : vector<1x32x32xf32> to vector<32x32xf32>
    %cst_168 = arith.constant dense<0.000000e+00> : vector<32x256xf32>
    %238 = tpu.matmul %237, %235, %cst_168 {dimension_numbers = #tpu.dot_dimension_numbers<[1], [0], [0], [1], [0, 0, 1, 1], [], []>} : vector<32x32xf32>, vector<32x256xf32>, vector<32x256xf32> -> vector<32x256xf32>
    %c7_169 = arith.constant 7 : index
    %c0_170 = arith.constant 0 : index
    %c0_171 = arith.constant 0 : index
    %239 = vector.load %arg5[%c7_169, %c0_170, %c0_171] : memref<8x32x1xf32, #tpu.memory_space<vmem>>, vector<1x32x1xf32>
    %240 = vector.shape_cast %239 : vector<1x32x1xf32> to vector<32x1xf32>
    %241 = vector.broadcast %240 : vector<32x1xf32> to vector<32x256xf32>
    %242 = arith.addf %238, %241 : vector<32x256xf32>
    %cst_172 = arith.constant 0.000000e+00 : f32
    %243 = vector.broadcast %cst_172 : f32 to vector<32x256xf32>
    %244 = arith.maximumf %242, %243 : vector<32x256xf32>
    %c7_173 = arith.constant 7 : index
    %c0_174 = arith.constant 0 : index
    %c0_175 = arith.constant 0 : index
    %245 = vector.load %arg6[%c7_173, %c0_174, %c0_175] : memref<8x4x32xf32, #tpu.memory_space<vmem>>, vector<1x4x32xf32>
    %246 = vector.shape_cast %245 : vector<1x4x32xf32> to vector<4x32xf32>
    %cst_176 = arith.constant dense<0.000000e+00> : vector<4x256xf32>
    %247 = tpu.matmul %246, %244, %cst_176 {dimension_numbers = #tpu.dot_dimension_numbers<[1], [0], [0], [1], [0, 0, 1, 1], [], []>} : vector<4x32xf32>, vector<32x256xf32>, vector<4x256xf32> -> vector<4x256xf32>
    %c7_177 = arith.constant 7 : index
    %c0_178 = arith.constant 0 : index
    %c0_179 = arith.constant 0 : index
    %248 = vector.load %arg7[%c7_177, %c0_178, %c0_179] : memref<8x4x1xf32, #tpu.memory_space<vmem>>, vector<1x4x1xf32>
    %249 = vector.shape_cast %248 : vector<1x4x1xf32> to vector<4x1xf32>
    %250 = vector.broadcast %249 : vector<4x1xf32> to vector<4x256xf32>
    %251 = arith.addf %247, %250 : vector<4x256xf32>
    %252 = vector.extract_strided_slice %251 {offsets = [0, 0], sizes = [2, 256], strides = [1, 1]} : vector<4x256xf32> to vector<2x256xf32>
    %253 = math.tanh %252 : vector<2x256xf32>
    %254 = vector.extract_strided_slice %251 {offsets = [2, 0], sizes = [2, 256], strides = [1, 1]} : vector<4x256xf32> to vector<2x256xf32>
    %255 = math.exp %253 : vector<2x256xf32>
    %256 = arith.mulf %255, %193 : vector<2x256xf32>
    %257 = arith.addf %256, %254 : vector<2x256xf32>
    %258 = arith.addf %226, %253 : vector<2x256xf32>
    %259 = tpu.concatenate %257, %225, %258 in 0 : vector<2x256xf32>, vector<2x256xf32>, vector<2x256xf32> -> vector<6x256xf32>
    %c0_180 = arith.constant 0 : index
    %c0_181 = arith.constant 0 : index
    %260 = vector.load %arg8[%c0_180, %c0_181] : memref<6x256xf32, #tpu.memory_space<vmem>>, vector<6x256xf32>
    tpu.vector_store %arg8[%c0_180, %c0_181], %259 {strides = array<i32>} : memref<6x256xf32, #tpu.memory_space<vmem>>, vector<6x256xf32>,
    return
  }
  func.func @transform_0(%arg0: i32) -> (i32, i32) {
    %c0_i32 = arith.constant 0 : i32
    %c0_i32_0 = arith.constant 0 : i32
    return %c0_i32, %arg0 : i32, i32
  }
  func.func @transform_1(%arg0: i32) -> (i32, i32, i32) {
    %c0_i32 = arith.constant 0 : i32
    %c0_i32_0 = arith.constant 0 : i32
    %c0_i32_1 = arith.constant 0 : i32
    %c0_i32_2 = arith.constant 0 : i32
    return %c0_i32, %c0_i32_0, %c0_i32_1 : i32, i32, i32
  }
  func.func @transform_2(%arg0: i32) -> (i32, i32, i32) {
    %c0_i32 = arith.constant 0 : i32
    %c0_i32_0 = arith.constant 0 : i32
    %c0_i32_1 = arith.constant 0 : i32
    %c0_i32_2 = arith.constant 0 : i32
    return %c0_i32, %c0_i32_0, %c0_i32_1 : i32, i32, i32
  }
  func.func @transform_3(%arg0: i32) -> (i32, i32, i32) {
    %c0_i32 = arith.constant 0 : i32
    %c0_i32_0 = arith.constant 0 : i32
    %c0_i32_1 = arith.constant 0 : i32
    %c0_i32_2 = arith.constant 0 : i32
    return %c0_i32, %c0_i32_0, %c0_i32_1 : i32, i32, i32
  }
  func.func @transform_4(%arg0: i32) -> (i32, i32, i32) {
    %c0_i32 = arith.constant 0 : i32
    %c0_i32_0 = arith.constant 0 : i32
    %c0_i32_1 = arith.constant 0 : i32
    %c0_i32_2 = arith.constant 0 : i32
    return %c0_i32, %c0_i32_0, %c0_i32_1 : i32, i32, i32
  }
  func.func @transform_5(%arg0: i32) -> (i32, i32, i32) {
    %c0_i32 = arith.constant 0 : i32
    %c0_i32_0 = arith.constant 0 : i32
    %c0_i32_1 = arith.constant 0 : i32
    %c0_i32_2 = arith.constant 0 : i32
    return %c0_i32, %c0_i32_0, %c0_i32_1 : i32, i32, i32
  }
  func.func @transform_6(%arg0: i32) -> (i32, i32, i32) {
    %c0_i32 = arith.constant 0 : i32
    %c0_i32_0 = arith.constant 0 : i32
    %c0_i32_1 = arith.constant 0 : i32
    %c0_i32_2 = arith.constant 0 : i32
    return %c0_i32, %c0_i32_0, %c0_i32_1 : i32, i32, i32
  }
  func.func @transform_7(%arg0: i32) -> (i32, i32) {
    %c0_i32 = arith.constant 0 : i32
    %c0_i32_0 = arith.constant 0 : i32
    return %c0_i32, %arg0 : i32, i32
  }
}

</mosaic_0001>

<bundles_post_ra>
// kernel: tpu_custom_call.1
= control target key start
LH: loop header
LB: loop body
LE: loop exit
PB: predicated region body
PF: predicated region fallthrough
CT: control target
= control target key end

     0   :  { %12 = vsyncpa [#allocation3], 0  ;;  %s4837_s0 = inlined_call_operand.vmem [shape: f32[4,512], index: 0, kind: input, shape index: {}]   ;;  %s4838_s1 = inlined_call_operand.vmem [shape: f32[8,32,2], index: 1, kind: input, shape index: {}]   ;;  %s4839_s2 = inlined_call_operand.vmem [shape: f32[8,32,1], index: 2, kind: input, shape index: {}]   ;;  %s4840_s3 = inlined_call_operand.vmem [shape: f32[8,32,32], index: 3, kind: input, shape index: {}]   ;;  %s4841_s4 = inlined_call_operand.vmem [shape: f32[8,32,1], index: 4, kind: input, shape index: {}]   ;;  %s4842_s5 = inlined_call_operand.vmem [shape: f32[8,4,32], index: 5, kind: input, shape index: {}]   ;;  %s4843_s6 = inlined_call_operand.vmem [shape: f32[8,4,1], index: 6, kind: input, shape index: {}]   ;;  %s4844_s7 = inlined_call_operand.hbm [shape: f32[6,512], index: 7, kind: output, shape index: {}]  }
   0x1   :  { %14 = vsyncpa [#allocation3 + $0x1], 0  ;;  %s4028_s24 = smov 0   ;;  %s4030_s25 = smov 0  }
   0x2   :  { %s4032_s26 = smov 0   ;;  %s4034_s27 = smov 0  }
   0x3 LB: > { %s4049_s28 = sadd.s32 4294967295, %s3983_s27   ;;  %s3457_s29 = sadd.s32 4294967294, %s3983_s27   ;;  %s3983_s27 = sphi %s4034_s27, %s4850_s27   ;;  %s3979_s26 = sphi %s4032_s26, %s4849_s26   ;;  %s3975_s25 = sphi %s4030_s25, %s4848_s25   ;;  %s3971_s24 = sphi %s4028_s24, %s4847_s24  }
   0x4   : > { %s4053_s30 = sadd.s32 1, %s3983_s27   ;;  %s179_s8 = sadd.s32 1, %s3979_s26 }
   0x5   : > { %s176_s9 = ssub.s32 %s3983_s27, %s4053_s30  ;;  %p189_p0 = scmp.ne.s32.totalorder %s3979_s26, %s3975_s25 }
   0x6   : > { %p177_p1 = scmp.eq.s32.totalorder %s176_s9, 0  ;;  %p190_p2 = scmp.eq.s32.totalorder %s4049_s28, 1 }
   0x7   : > { %p195_p3 = scmp.ne.s32.totalorder %s3975_s25, %s3971_s24  ;;  %p196_p4 = scmp.eq.s32.totalorder %s3457_s29, 1 }
   0x8   : > { %s4064_s10 = scalar_select %p177_p1, %s3979_s26, %s179_s8  }
   0x9   : > { %p4066_p5 = por %p190_p2, %p189_p0  ;;  %p4070_p6 = por %p196_p4, %p195_p3 }
   0xa   : > { %p3460_p7 = scmp.ge.s32.totalorder %s3983_s27, 1  ;;  %p241_p8 = scmp.lt.s32.totalorder %s3983_s27, 3 }
   0xc   : > { %p242_p9 = pnand %p3460_p7, %p241_p8 }
   0xd   : > { %v288_v0 = vld [vmem:[%s4839_s2 + $0x10] sm:$0xff] (!%p242_p9)  ;;  %v286_v1 = vld [vmem:[%s4839_s2] sm:$0xff] (!%p242_p9)  ;;  %s3462_s17 = sshll.u32 (!%p242_p9), %s4049_s28, 1  ;;  %v3985_v2 = vmov (!%p242_p9), 0   ;;  %v289_v3 = vld [vmem:[%s4839_s2 + $0x18] sm:$0xff] (!%p242_p9)  ;;  %v3986_v5 = vmov (!%p242_p9), 0.0  }
   0xe   : > { %245 = sbr.rel (%p242_p9) target bundleno = 5763 (0x1683), region = 48  ;;  %3854 = vset.pattern.permute.xlu1 (!%p242_p9), %v3985_v2  ;;  %3853 = vset.pattern.permute.xlu0 (!%p242_p9), %v3985_v2  ;;  %p274_p10 = scmp.lt.s32.totalorder (!%p242_p9), %s3462_s17, 3  ;;  %v287_v4 = vld [vmem:[%s4839_s2 + $0x8] sm:$0xff] (!%p242_p9)  ;;  %v431_v7 = vld [vmem:[%s4841_s4] sm:$0xff] (!%p242_p9)  ;;  %vm325_vm0 = vcmask (!%p242_p9), 1041408   ;;  %vm312_vm1 = vcmask (!%p242_p9), 15360  }
   0xf   : > { %302 = vperm.xlu1 (!%p242_p9), %3854, %v288_v0   ;;  %292 = vperm.xlu0 (!%p242_p9), %3853, %v286_v1   ;;  %v432_v6 = vld [vmem:[%s4841_s4 + $0x8] sm:$0xff] (!%p242_p9)  ;;  %v282_v10 = vld [vmem:[%s4838_s1] sm:$0xff] (!%p242_p9)  ;;  %v434_v11 = vld [vmem:[%s4841_s4 + $0x18] sm:$0xff] (!%p242_p9)  ;;  %vm455_vm2 = vcmask (!%p242_p9), 261120   ;;  %s270_s23 = sand.u32 (!%p242_p9), 1, %s3975_s25   ;;  %vm3378_vm3 = vcmask (!%p242_p9), 1043456  }
  0x10   : > { %394 = vmatprep.mubr.f32.mxu0 (!%p242_p9), %v3986_v5  ;;  %532 = vmatprep.mubr.f32.mxu1 (!%p242_p9), %v3986_v5  ;;  %v433_v12 = vld [vmem:[%s4841_s4 + $0x10] sm:$0xff] (!%p242_p9)  ;;  %v283_v13 = vld [vmem:[%s4838_s1 + $0x8] sm:$0xff] (!%p242_p9)  ;;  %v3479_v14 = vld [vmem:[%s4839_s2 + $0x20] sm:$0xff] (!%p242_p9)  ;;  %s3461_s29 = sshll.u32 (!%p242_p9), %s270_s23, 4  ;;  %s3987_s18 = smov (!%p242_p9), [#allocation2]  }
  0x11   : > { %v566_v15 = vld [vmem:[%s4843_s6] sm:$0xf] (!%p242_p9)  ;;  %v284_v16 = vld [vmem:[%s4838_s1 + $0x10] sm:$0xff] (!%p242_p9)  ;;  %v3480_v18 = vld [vmem:[%s4839_s2 + $0x28] sm:$0xff] (!%p242_p9)  ;;  %s272_s9 = scalar_lea.vmem (!%p242_p9), [#allocation2], %s3461_s29  ;;  %s3925_s19 = sshll.u32 (!%p242_p9), %s3987_s18, 4  ;;  %s3926_s19 = int_to_ptr.vmem [resolvable:$false] %s3925_s19 }
  0x12   : > { %v3481_v17 = vld [vmem:[%s4839_s2 + $0x30] sm:$0xff] (!%p242_p9)  ;;  %v285_v19 = vld [vmem:[%s4838_s1 + $0x18] sm:$0xff] (!%p242_p9)  ;;  %v3493_v20 = vld [vmem:[%s4841_s4 + $0x20] sm:$0xff] (!%p242_p9)  ;;  %s3398_s13 = sshll.u32 (!%p242_p9), %s272_s9, 4  ;;  %s3927_s20 = scalar_lea.vmem (!%p242_p9), %s3926_s19, 512  ;;  %s4797_s13 = int_to_ptr.vmem [resolvable:$true] %s3398_s13 }
  0x13   : > { %307 = vperm.xlu1 (!%p242_p9), %3854, %v289_v3   ;;  %297 = vperm.xlu0 (!%p242_p9), %3853, %v287_v4   ;;  %v3482_v21 = vld [vmem:[%s4839_s2 + $0x38] sm:$0xff] (!%p242_p9)  ;;  %v3495_v22 = vld [vmem:[%s4841_s4 + $0x30] sm:$0xff] (!%p242_p9)  ;;  %v3494_v23 = vld [vmem:[%s4841_s4 + $0x28] sm:$0xff] (!%p242_p9)  ;;  %p3928_p0 = scmp.lt.s32.totalorder (!%p242_p9), %s4797_s13, %s3926_s19 }
  0x14   : > { %v3502_v24 = vld [vmem:[%s4843_s6 + $0x4] sm:$0xf] (!%p242_p9)  ;;  %v3496_v25 = vld [vmem:[%s4841_s4 + $0x38] sm:$0xff] (!%p242_p9)  ;;  %v3509_v26 = vld [vmem:[%s4839_s2 + $0x48] sm:$0xff] (!%p242_p9) }
  0x15   : > { %s4852_s17 = smov (!%p274_p10, %s3462_s17), 3  ;;  %v3508_v27 = vld [vmem:[%s4839_s2 + $0x40] sm:$0xff]  ;;  %v3511_v28 = vld [vmem:[%s4839_s2 + $0x58] sm:$0xff]  ;;  %v3510_v29 = vld [vmem:[%s4839_s2 + $0x50] sm:$0xff] }
  0x16   : > { %s3463_s22 = sshll.u32 %s4852_s17, 2  ;;  %v3523_v30 = vld [vmem:[%s4841_s4 + $0x48] sm:$0xff]  ;;  %v3522_v31 = vld [vmem:[%s4841_s4 + $0x40] sm:$0xff]  ;;  %v3525_v32 = vld [vmem:[%s4841_s4 + $0x58] sm:$0xff]  ;;  %s3921_s17 = scalar_lea.vmem %s4797_s13, 256 }
  0x17   : > { %s4094_s8 = scalar_lea.vmem %s4837_s0, %s3463_s22  ;;  %442 = vperm.xlu1 %3854, %v432_v6   ;;  %437 = vperm.xlu0 %3853, %v431_v7   ;;  %v3524_v33 = vld [vmem:[%s4841_s4 + $0x50] sm:$0xff]  ;;  %v3537_v34 = vld [vmem:[%s4839_s2 + $0x60] sm:$0xff]  ;;  %v3531_v35 = vld [vmem:[%s4843_s6 + $0x8] sm:$0xf]  ;;  %p3922_p11 = scmp.ne.s32.totalorder %s4797_s13, %s3921_s17 }
  0x18   : > { %v4103_v8 = vld [vmem:[%s4094_s8] sm:$0x33]  ;;  %v3539_v36 = vld [vmem:[%s4839_s2 + $0x70] sm:$0xff]  ;;  %v3538_v37 = vld [vmem:[%s4839_s2 + $0x68] sm:$0xff]  ;;  %p3929_p1 = scmp.lt.s32.totalorder %s3927_s20, %s3921_s17 }
  0x19   : > { %v4107_v9 = vcombine.high %v4103_v8, %v4103_v8  ;;  %v3551_v38 = vld [vmem:[%s4841_s4 + $0x60] sm:$0xff]  ;;  %v3540_v39 = vld [vmem:[%s4839_s2 + $0x78] sm:$0xff]  ;;  %v3553_v40 = vld [vmem:[%s4841_s4 + $0x70] sm:$0xff]  ;;  %p3923_p12 = pnand %p3922_p11, %p4066_p5 }
  0x1a   : > { %v3552_v41 = vld [vmem:[%s4841_s4 + $0x68] sm:$0xff]  ;;  %v3554_v43 = vld [vmem:[%s4841_s4 + $0x78] sm:$0xff]  ;;  %v3566_v45 = vld [vmem:[%s4839_s2 + $0x80] sm:$0xff]  ;;  %p3930_p2 = por %p3929_p1, %p3928_p0 }
  0x1b   : > { %3464 = vmatprep.subr.msk.mxu0 %vm325_vm0, %v4107_v9  ;;  %452 = vperm.xlu1 %3854, %v434_v11   ;;  %v3560_v42 = vld [vmem:[%s4843_s6 + $0xc] sm:$0xf]  ;;  %v3569_v46 = vld [vmem:[%s4839_s2 + $0x98] sm:$0xff]  ;;  %v3568_v47 = vld [vmem:[%s4839_s2 + $0x90] sm:$0xff]  ;;  %p3924_p13 = pneg %p3923_p12 }
  0x1c   : > { %3465 = vmatpush1.msk.msra.mxu0 %vm325_vm0, %v4103_v8  ;;  %447 = vperm.xlu0 %3853, %v433_v12   ;;  %v3567_v44 = vld [vmem:[%s4839_s2 + $0x88] sm:$0xff]  ;;  %v3580_v49 = vld [vmem:[%s4841_s4 + $0x80] sm:$0xff]  ;;  %v3583_v50 = vld [vmem:[%s4841_s4 + $0x98] sm:$0xff] }
  0x1d   : > { %3466 = vmatmul.mubr.msk.f32.vlgmr.msra.gmra.mrb[0].mxu0 %vm312_vm1, %v282_v10  ;;  %v3581_v48 = vld [vmem:[%s4841_s4 + $0x88] sm:$0xff]  ;;  %v3582_v51 = vld [vmem:[%s4841_s4 + $0x90] sm:$0xff]  ;;  %v3595_v52 = vld [vmem:[%s4839_s2 + $0xa0] sm:$0xff]  ;;  %p3931_p3 = pnand %p3930_p2, %p3924_p13 }
  0x1e   : > { %400 = vmatprep.mubr.f32.mxu0 %v3986_v5  ;;  %v3589_v53 = vld [vmem:[%s4843_s6 + $0x10] sm:$0xf]  ;;  %v3596_v55 = vld [vmem:[%s4839_s2 + $0xa8] sm:$0xff]  ;;  %v3609_v56 = vld [vmem:[%s4841_s4 + $0xa0] sm:$0xff] }
  0x1f   : > { %682 = vperm.xlu1 %3854, %v3479_v14   ;;  %v3597_v54 = vld [vmem:[%s4839_s2 + $0xb0] sm:$0xff]  ;;  %v3598_v57 = vld [vmem:[%s4839_s2 + $0xb8] sm:$0xff]  ;;  %v3610_v59 = vld [vmem:[%s4841_s4 + $0xa8] sm:$0xff] }
  0x20   : > { %569 = vperm.xlu0 %3853, %v566_v15   ;;  %v3611_v58 = vld [vmem:[%s4841_s4 + $0xb0] sm:$0xff]  ;;  %v3612_v61 = vld [vmem:[%s4841_s4 + $0xb8] sm:$0xff]  ;;  %v3625_v62 = vld [vmem:[%s4839_s2 + $0xc8] sm:$0xff] }
  0x21   : > { %3467 = vmatmul.mubr.msk.f32.gmra.mrb[2].mxu0 %vm312_vm1, %v283_v13  ;;  %v3618_v60 = vld [vmem:[%s4843_s6 + $0x14] sm:$0xf]  ;;  %v3624_v63 = vld [vmem:[%s4839_s2 + $0xc0] sm:$0xff]  ;;  %v3627_v0 = vld [vmem:[%s4839_s2 + $0xd8] sm:$0xff] }
  0x22   : > { %406 = vmatprep.mubr.f32.mxu0 %v3986_v5  ;;  %v3626_v1 = vld [vmem:[%s4839_s2 + $0xd0] sm:$0xff]  ;;  %v3639_v2 = vld [vmem:[%s4841_s4 + $0xc8] sm:$0xff]  ;;  %v3638_v3 = vld [vmem:[%s4841_s4 + $0xc0] sm:$0xff] }
  0x23   : > { %692 = vperm.xlu1 %3854, %v3481_v17   ;;  %v3641_v4 = vld [vmem:[%s4841_s4 + $0xd8] sm:$0xff]  ;;  %v3640_v6 = vld [vmem:[%s4841_s4 + $0xd0] sm:$0xff]  ;;  %v3653_v7 = vld [vmem:[%s4839_s2 + $0xe0] sm:$0xff] }
  0x24   : > { %687 = vperm.xlu0 %3853, %v3480_v18   ;;  %v3647_v10 = vld [vmem:[%s4843_s6 + $0x18] sm:$0xf]  ;;  %v3655_v11 = vld [vmem:[%s4839_s2 + $0xf0] sm:$0xff]  ;;  %v3654_v12 = vld [vmem:[%s4839_s2 + $0xe8] sm:$0xff] }
  0x25   : > { %3468 = vmatmul.mubr.msk.f32.gmra.mrb[4].mxu0 %vm312_vm1, %v284_v16  ;;  %v3667_v13 = vld [vmem:[%s4841_s4 + $0xe0] sm:$0xff]  ;;  %v3656_v14 = vld [vmem:[%s4839_s2 + $0xf8] sm:$0xff]  ;;  %v3669_v15 = vld [vmem:[%s4841_s4 + $0xf0] sm:$0xff] }
  0x26   : > { %412 = vmatprep.mubr.f32.mxu0 %v3986_v5  ;;  %v3668_v16 = vld [vmem:[%s4841_s4 + $0xe8] sm:$0xff]  ;;  %v3676_v17 = vld [vmem:[%s4843_s6 + $0x1c] sm:$0xf] }
  0x27   : > { %827 = vperm.xlu1 %3854, %v3493_v20   ;;  %v3670_v18 = vld [vmem:[%s4841_s4 + $0xf8] sm:$0xff] }
  0x28   : > { %697 = vperm.xlu0 %3853, %v3482_v21  }
  0x29   : > { %3469 = vmatmul.mubr.msk.f32.gmra.mrb[6].mxu0 %vm312_vm1, %v285_v19 }
  0x2a   : > { %639 = vmatprep.mubr.f32.mxu0 %v3986_v5 }
  0x2b   : > { %837 = vperm.xlu1 %3854, %v3495_v22  }
  0x2c   : > { %832 = vperm.xlu0 %3853, %v3494_v23  }
  0x2f   : > { %960 = vperm.xlu1 %3854, %v3502_v24  }
  0x30   : > { %842 = vperm.xlu0 %3853, %v3496_v25  }
  0x33   : > { %1073 = vperm.xlu1 %3854, %v3509_v26  }
  0x34   : > { %1068 = vperm.xlu0 %3853, %v3508_v27  }
  0x37   : > { %1083 = vperm.xlu1 %3854, %v3511_v28  }
  0x38   : > { %1078 = vperm.xlu0 %3853, %v3510_v29  }
  0x3b   : > { %1218 = vperm.xlu1 %3854, %v3523_v30  }
  0x3c   : > { %1213 = vperm.xlu0 %3853, %v3522_v31  }
  0x3f   : > { %1228 = vperm.xlu1 %3854, %v3525_v32  }
  0x40   : > { %1223 = vperm.xlu0 %3853, %v3524_v33  }
  0x43   : > { %1453 = vperm.xlu1 %3854, %v3537_v34  }
  0x44   : > { %1346 = vperm.xlu0 %3853, %v3531_v35  }
  0x47   : > { %1463 = vperm.xlu1 %3854, %v3539_v36  }
  0x48   : > { %1458 = vperm.xlu0 %3853, %v3538_v37  }
  0x4b   : > { %1598 = vperm.xlu1 %3854, %v3551_v38  }
  0x4c   : > { %1468 = vperm.xlu0 %3853, %v3540_v39  }
  0x4f   : > { %1608 = vperm.xlu1 %3854, %v3553_v40  }
  0x50   : > { %1603 = vperm.xlu0 %3853, %v3552_v41  }
  0x53   : > { %1731 = vperm.xlu1 %3854, %v3560_v42  }
  0x54   : > { %1613 = vperm.xlu0 %3853, %v3554_v43  }
  0x57   : > { %1843 = vperm.xlu1 %3854, %v3567_v44  }
  0x58   : > { %1838 = vperm.xlu0 %3853, %v3566_v45  }
  0x5b   : > { %1853 = vperm.xlu1 %3854, %v3569_v46  }
  0x5c   : > { %1848 = vperm.xlu0 %3853, %v3568_v47  }
  0x5f   : > { %1988 = vperm.xlu1 %3854, %v3581_v48  }
  0x60   : > { %1983 = vperm.xlu0 %3853, %v3580_v49  }
  0x63   : > { %1998 = vperm.xlu1 %3854, %v3583_v50  }
  0x64   : > { %1993 = vperm.xlu0 %3853, %v3582_v51   ;;  %v427_v51 = vld [vmem:[%s4840_s3] sm:$0xff] }
  0x67   : > { %2223 = vperm.xlu1 %3854, %v3595_v52   ;;  %v428_v52 = vld [vmem:[%s4840_s3 + $0x8] sm:$0xff] }
  0x68   : > { %2116 = vperm.xlu0 %3853, %v3589_v53   ;;  %v429_v53 = vld [vmem:[%s4840_s3 + $0x10] sm:$0xff] }
  0x6b   : > { %2233 = vperm.xlu1 %3854, %v3597_v54   ;;  %v430_v54 = vld [vmem:[%s4840_s3 + $0x18] sm:$0xff] }
  0x6c   : > { %2228 = vperm.xlu0 %3853, %v3596_v55  }
  0x6f   : > { %2368 = vperm.xlu1 %3854, %v3609_v56  }
  0x70   : > { %2238 = vperm.xlu0 %3853, %v3598_v57  }
  0x73   : > { %2378 = vperm.xlu1 %3854, %v3611_v58  }
  0x74   : > { %2373 = vperm.xlu0 %3853, %v3610_v59  }
  0x77   : > { %2501 = vperm.xlu1 %3854, %v3618_v60  }
  0x78   : > { %2383 = vperm.xlu0 %3853, %v3612_v61  }
  0x7b   : > { %2613 = vperm.xlu1 %3854, %v3625_v62  }
  0x7c   : > { %2608 = vperm.xlu0 %3853, %v3624_v63  }
  0x7f   : > { %2623 = vperm.xlu1 %3854, %v3627_v0  }
  0x80   : > { %2618 = vperm.xlu0 %3853, %v3626_v1  }
  0x83   : > { %2758 = vperm.xlu1 %3854, %v3639_v2  }
  0x84   : > { %2753 = vperm.xlu0 %3853, %v3638_v3  }
  0x87   : > { %2768 = vperm.xlu1 %3854, %v3641_v4  }
  0x88   : > { %2763 = vperm.xlu0 %3853, %v3640_v6  }
  0x8b   : > { %2993 = vperm.xlu1 %3854, %v3653_v7  }
  0x8c   : > { %2886 = vperm.xlu0 %3853, %v3647_v10  }
  0x8e   : > { %v293_v19 = vpop.permute.xlu0 %292  ;;  %v303_v28 = vpop.permute.xlu1 %302 }
  0x8f   : > { %3003 = vperm.xlu1 %3854, %v3655_v11  }
  0x90   : > { %2998 = vperm.xlu0 %3853, %v3654_v12  }
  0x92   : > { %v298_v23 = vpop.permute.xlu0 %297  ;;  %v308_v39 = vpop.permute.xlu1 %307 }
  0x93   : > { %3138 = vperm.xlu1 %3854, %v3667_v13  }
  0x94   : > { %3008 = vperm.xlu0 %3853, %v3656_v14  }
  0x96   : > { %v438_v57 = vpop.permute.xlu0 %437  ;;  %v443_v59 = vpop.permute.xlu1 %442 }
  0x97   : > { %3148 = vperm.xlu1 %3854, %v3669_v15  }
  0x98   : > { %3143 = vperm.xlu0 %3853, %v3668_v16  }
  0x9a   : > { %v453_v14 = vpop.permute.xlu1 %452 }
  0x9b   : > { %3271 = vperm.xlu1 %3854, %v3676_v17   ;;  %v448_v11 = vpop.permute.xlu0 %447 }
  0x9c   : > { %3153 = vperm.xlu0 %3853, %v3670_v18  }
  0xf0   : > { %v396_v20 = vpop.f32.mrb[0].mxu0 }
  0xf1   : > { %v398_v21 = vpop.f32.mrb[1].mxu0  ;;  %v397_v22 = vadd.f32 %v396_v20, %v293_v19 }
  0xf2   : > { %v399_v24 = vadd.f32 %v398_v21, %v293_v19 }
  0xf3   : > { %v419_v30 = vmax.f32 %v397_v22, 0.0 }
  0xf4   : > { %v402_v25 = vpop.f32.mrb[2].mxu0  ;;  %v420_v32 = vmax.f32 %v399_v24, 0.0 }
  0xf5   : > { %v403_v26 = vadd.f32 %v402_v25, %v298_v23  ;;  %v404_v27 = vpop.f32.mrb[3].mxu0 }
  0xf6   : > { %v405_v29 = vadd.f32 %v404_v27, %v298_v23  ;;  %v570_v27 = vpop.permute.xlu0 %569 }
  0xf7   : > { %v421_v31 = vmax.f32 %v403_v26, 0.0  ;;  %v565_v26 = vld [vmem:[%s4842_s5] sm:$0xf] }
  0xf8   : > { %v422_v33 = vmax.f32 %v405_v29, 0.0  ;;  %v408_v34 = vpop.f32.mrb[4].mxu0 }
  0xf9   : > { %v410_v35 = vpop.f32.mrb[5].mxu0  ;;  %v3686_v36 = vpack.c.bf16 %v421_v31, %v419_v30  ;;  %v409_v38 = vadd.f32 %v408_v34, %v303_v28 }
  0xfa   : > { %v3684_v37 = vpack.c.bf16 %v422_v33, %v420_v32  ;;  %v411_v40 = vadd.f32 %v410_v35, %v303_v28 }
  0xfb   : > { %v423_v45 = vmax.f32 %v409_v38, 0.0 }
  0xfc   : > { %v414_v41 = vpop.f32.mrb[6].mxu0  ;;  %3685 = vmatprep.subr.bf16.mxu1 %v3684_v37  ;;  %v424_v47 = vmax.f32 %v411_v40, 0.0 }
  0xfd   : > { %v415_v42 = vadd.f32 %v414_v41, %v308_v39  ;;  %v416_v43 = vpop.f32.mrb[7].mxu0  ;;  %3687 = vmatpush1.bf16.msra.mxu1 %v3686_v36  ;;  %v281_v36 = vld [vmem:[%s4094_s8] sm:$0xcc]  ;;  %s3683_s8 = sshll.u32 %s4049_s28, 8  ;;  %s3384_s28 = scalar_lea.sflag [#allocation3], %s270_s23 }
  0xfe   : > { %v417_v44 = vadd.f32 %v416_v43, %v308_v39  ;;  %v653_v37 = vcombine.high %v281_v36, %v281_v36  ;;  %v654_v38 = vrot.slane %v281_v36, 2  ;;  %s4795_s16 = scalar_lea.hbm %s4844_s7, %s3683_s8 }
  0xff   : > { %v425_v46 = vmax.f32 %v415_v42, 0.0 }
 0x100   : > { %v426_v48 = vmax.f32 %v417_v44, 0.0  ;;  %v655_v39 = vrot.slane %v653_v37, 2 }
 0x101   : > { %v3690_v49 = vpack.c.bf16 %v425_v46, %v423_v45 }
 0x102   : > { %v3688_v50 = vpack.c.bf16 %v426_v48, %v424_v47  ;;  %v3475_v48 = vld [vmem:[%s4838_s1 + $0x20] sm:$0xff] }
 0x104   : > { %3689 = vmatprep.subr.bf16.mxu1 %v3688_v50  ;;  %v3477_v50 = vld [vmem:[%s4838_s1 + $0x30] sm:$0xff] }
 0x105   : > { %3691 = vmatpush1.bf16.msra.mxu1 %v3690_v49  ;;  %v3476_v49 = vld [vmem:[%s4838_s1 + $0x28] sm:$0xff] }
 0x108   : > { %3470 = vmatmul.mubr.msk.f32.vlgmr.msra.gmra.mrb[0].mxu1 %vm455_vm2, %v427_v51  ;;  %v3478_v51 = vld [vmem:[%s4838_s1 + $0x38] sm:$0xff] }
 0x109   : > { %538 = vmatprep.mubr.f32.mxu1 %v3986_v5 }
 0x10c   : > { %3471 = vmatmul.mubr.msk.f32.gmra.mrb[2].mxu1 %vm455_vm2, %v428_v52 }
 0x10d   : > { %544 = vmatprep.mubr.f32.mxu1 %v3986_v5 }
 0x110   : > { %3472 = vmatmul.mubr.msk.f32.gmra.mrb[4].mxu1 %vm455_vm2, %v429_v53 }
 0x111   : > { %550 = vmatprep.mubr.f32.mxu1 %v3986_v5 }
 0x114   : > { %3473 = vmatmul.mubr.msk.f32.gmra.mrb[6].mxu1 %vm455_vm2, %v430_v54  ;;  %v683_v54 = vpop.permute.xlu1 %682 }
 0x115   : > { %921 = vmatprep.mubr.f32.mxu1 %v3986_v5 }
 0x1db   : > { %v534_v55 = vpop.f32.mrb[0].mxu1 }
 0x1dc   : > { %v536_v56 = vpop.f32.mrb[1].mxu1  ;;  %v535_v58 = vadd.f32 %v534_v55, %v438_v57 }
 0x1dd   : > { %v537_v60 = vadd.f32 %v536_v56, %v438_v57  ;;  %v688_v56 = vpop.permute.xlu0 %687 }
 0x1de   : > { %v557_v1 = vmax.f32 %v535_v58, 0.0 }
 0x1df   : > { %v540_v61 = vpop.f32.mrb[2].mxu1  ;;  %v558_v3 = vmax.f32 %v537_v60, 0.0 }
 0x1e0   : > { %v541_v62 = vadd.f32 %v540_v61, %v443_v59  ;;  %v542_v63 = vpop.f32.mrb[3].mxu1 }
 0x1e1   : > { %v543_v0 = vadd.f32 %v542_v63, %v443_v59 }
 0x1e2   : > { %v559_v2 = vmax.f32 %v541_v62, 0.0 }
 0x1e3   : > { %v560_v4 = vmax.f32 %v543_v0, 0.0  ;;  %v546_v6 = vpop.f32.mrb[4].mxu1 }
 0x1e4   : > { %v3694_v7 = vpack.c.bf16 %v559_v2, %v557_v1  ;;  %v548_v10 = vpop.f32.mrb[5].mxu1  ;;  %v547_v13 = vadd.f32 %v546_v6, %v448_v11  ;;  %v693_v6 = vpop.permute.xlu1 %692 }
 0x1e5   : > { %v3692_v12 = vpack.c.bf16 %v560_v4, %v558_v3  ;;  %v549_v15 = vadd.f32 %v548_v10, %v448_v11  ;;  %v698_v11 = vpop.permute.xlu0 %697 }
 0x1e6   : > { %v561_v20 = vmax.f32 %v547_v13, 0.0 }
 0x1e7   : > { %v552_v16 = vpop.f32.mrb[6].mxu1  ;;  %3693 = vmatprep.subr.bf16.mxu0 %v3692_v12  ;;  %v562_v22 = vmax.f32 %v549_v15, 0.0 }
 0x1e8   : > { %v553_v17 = vadd.f32 %v552_v16, %v453_v14  ;;  %v554_v18 = vpop.f32.mrb[7].mxu1  ;;  %3695 = vmatpush1.bf16.msra.mxu0 %v3694_v7 }
 0x1e9   : > { %v555_v19 = vadd.f32 %v554_v18, %v453_v14 }
 0x1ea   : > { %v563_v21 = vmax.f32 %v553_v17, 0.0 }
 0x1eb   : > { %v564_v23 = vmax.f32 %v555_v19, 0.0 }
 0x1ec   : > { %v3698_v24 = vpack.c.bf16 %v563_v21, %v561_v20 }
 0x1ed   : > { %v3696_v25 = vpack.c.bf16 %v564_v23, %v562_v22  ;;  %v3489_v23 = vld [vmem:[%s4840_s3 + $0x20] sm:$0xff] }
 0x1ef   : > { %3697 = vmatprep.subr.bf16.mxu0 %v3696_v25  ;;  %v3491_v25 = vld [vmem:[%s4840_s3 + $0x30] sm:$0xff] }
 0x1f0   : > { %3699 = vmatpush1.bf16.msra.mxu0 %v3698_v24  ;;  %v3490_v24 = vld [vmem:[%s4840_s3 + $0x28] sm:$0xff] }
 0x1f3   : > { %3474 = vmatmul.mubr.msk.f32.vlgmr.msra.gmra.mrb[8].mxu0 %vm455_vm2, %v565_v26  ;;  %v3492_v26 = vld [vmem:[%s4840_s3 + $0x38] sm:$0xff] }
 0x1f4   : > { %782 = vmatprep.mubr.f32.mxu0 %v3986_v5 }
 0x2c6   : > { %v641_v28 = vpop.f32.mrb[8].mxu0 }
 0x2c7   : > { %v642_v29 = vadd.f32 %v641_v28, %v570_v27  ;;  %v643_v30 = vpop.f32.mrb[9].mxu0 }
 0x2c8   : > { %v644_v31 = vadd.f32 %v643_v30, %v570_v27 }
 0x2c9   : > { %3857 = vtanh.f32 %v642_v29  ;;  %v662_v43 = vrot.slane %v642_v29, 2  ;;  %v828_v29 = vpop.permute.xlu1 %827 }
 0x2ca   : > { %3859 = vtanh.f32 %v644_v31  ;;  %v663_v45 = vrot.slane %v644_v31, 2  ;;  %v833_v31 = vpop.permute.xlu0 %832 }
 0x2d3   : > { %v4356_v32 = vpop.eup %3857 }
 0x2d4   : > { %v4358_v33 = vpop.eup %3859  ;;  %v648_v34 = vmul.f32 1.442695, %v4356_v32 }
 0x2d5   : > { %v650_v35 = vmul.f32 1.442695, %v4358_v33 }
 0x2d6   : > { %3861 = vpow2.f32 %v648_v34 }
 0x2d7   : > { %3863 = vpow2.f32 %v650_v35 }
 0x2e0   : > { %v3862_v40 = vpop.eup %3861 }
 0x2e1   : > { %v3864_v41 = vpop.eup %3863  ;;  %v658_v42 = vmul.f32 %v3862_v40, %v654_v38 }
 0x2e2   : > { %v659_v44 = vmul.f32 %v3864_v41, %v655_v39 }
 0x2e3   : > { %v4363_v46 = vadd.f32 %v662_v43, %v658_v42 }
 0x2e4   : > { %v4365_v47 = vadd.f32 %v663_v45, %v659_v44 }
 0x2e6   : > { %3483 = vmatprep.subr.msk.mxu0 %vm325_vm0, %v4365_v47 }
 0x2e7   : > { %3484 = vmatpush1.msk.msra.mxu0 %vm325_vm0, %v4363_v46 }
 0x2e8   : > { %3485 = vmatmul.mubr.msk.f32.vlgmr.msra.gmra.mrb[10].mxu0 %vm312_vm1, %v3475_v48  ;;  %v838_v48 = vpop.permute.xlu1 %837 }
 0x2e9   : > { %788 = vmatprep.mubr.f32.mxu0 %v3986_v5 }
 0x2ec   : > { %3486 = vmatmul.mubr.msk.f32.gmra.mrb[12].mxu0 %vm312_vm1, %v3476_v49 }
 0x2ed   : > { %794 = vmatprep.mubr.f32.mxu0 %v3986_v5 }
 0x2f0   : > { %3487 = vmatmul.mubr.msk.f32.gmra.mrb[14].mxu0 %vm312_vm1, %v3477_v50 }
 0x2f1   : > { %800 = vmatprep.mubr.f32.mxu0 %v3986_v5 }
 0x2f4   : > { %3488 = vmatmul.mubr.msk.f32.gmra.mrb[16].mxu0 %vm312_vm1, %v3478_v51  ;;  %v843_v51 = vpop.permute.xlu0 %842 }
 0x2f5   : > { %1030 = vmatprep.mubr.f32.mxu0 %v3986_v5 }
 0x3bb   : > { %v784_v52 = vpop.f32.mrb[10].mxu0 }
 0x3bc   : > { %v786_v53 = vpop.f32.mrb[11].mxu0  ;;  %v785_v55 = vadd.f32 %v784_v52, %v683_v54 }
 0x3bd   : > { %v787_v57 = vadd.f32 %v786_v53, %v683_v54 }
 0x3be   : > { %v807_v62 = vmax.f32 %v785_v55, 0.0 }
 0x3bf   : > { %v790_v58 = vpop.f32.mrb[12].mxu0  ;;  %v808_v0 = vmax.f32 %v787_v57, 0.0 }
 0x3c0   : > { %v791_v59 = vadd.f32 %v790_v58, %v688_v56  ;;  %v792_v60 = vpop.f32.mrb[13].mxu0 }
 0x3c1   : > { %v793_v61 = vadd.f32 %v792_v60, %v688_v56 }
 0x3c2   : > { %v809_v63 = vmax.f32 %v791_v59, 0.0 }
 0x3c3   : > { %v810_v1 = vmax.f32 %v793_v61, 0.0  ;;  %v796_v2 = vpop.f32.mrb[14].mxu0 }
 0x3c4   : > { %v3702_v3 = vpack.c.bf16 %v809_v63, %v807_v62  ;;  %v798_v4 = vpop.f32.mrb[15].mxu0  ;;  %v797_v10 = vadd.f32 %v796_v2, %v693_v6  ;;  %v3501_v63 = vld [vmem:[%s4842_s5 + $0x4] sm:$0xf] }
 0x3c5   : > { %v3700_v7 = vpack.c.bf16 %v810_v1, %v808_v0  ;;  %v799_v12 = vadd.f32 %v798_v4, %v693_v6  ;;  %v961_v0 = vpop.permute.xlu1 %960 }
 0x3c6   : > { %v811_v17 = vmax.f32 %v797_v10, 0.0 }
 0x3c7   : > { %v802_v13 = vpop.f32.mrb[16].mxu0  ;;  %3701 = vmatprep.subr.bf16.mxu1 %v3700_v7  ;;  %v812_v19 = vmax.f32 %v799_v12, 0.0 }
 0x3c8   : > { %v803_v14 = vadd.f32 %v802_v13, %v698_v11  ;;  %v804_v15 = vpop.f32.mrb[17].mxu0  ;;  %3703 = vmatpush1.bf16.msra.mxu1 %v3702_v3 }
 0x3c9   : > { %v805_v16 = vadd.f32 %v804_v15, %v698_v11 }
 0x3ca   : > { %v813_v18 = vmax.f32 %v803_v14, 0.0 }
 0x3cb   : > { %v814_v20 = vmax.f32 %v805_v16, 0.0 }
 0x3cc   : > { %v3706_v21 = vpack.c.bf16 %v813_v18, %v811_v17 }
 0x3cd   : > { %v3704_v22 = vpack.c.bf16 %v814_v20, %v812_v19  ;;  %v3504_v20 = vld [vmem:[%s4838_s1 + $0x40] sm:$0xff] }
 0x3cf   : > { %3705 = vmatprep.subr.bf16.mxu1 %v3704_v22 }
 0x3d0   : > { %3707 = vmatpush1.bf16.msra.mxu1 %v3706_v21  ;;  %v3507_v21 = vld [vmem:[%s4838_s1 + $0x58] sm:$0xff] }
 0x3d3   : > { %3497 = vmatmul.mubr.msk.f32.vlgmr.msra.gmra.mrb[8].mxu1 %vm455_vm2, %v3489_v23 }
 0x3d4   : > { %927 = vmatprep.mubr.f32.mxu1 %v3986_v5 }
 0x3d7   : > { %3498 = vmatmul.mubr.msk.f32.gmra.mrb[10].mxu1 %vm455_vm2, %v3490_v24  ;;  %v1069_v24 = vpop.permute.xlu0 %1068 }
 0x3d8   : > { %933 = vmatprep.mubr.f32.mxu1 %v3986_v5 }
 0x3db   : > { %3499 = vmatmul.mubr.msk.f32.gmra.mrb[12].mxu1 %vm455_vm2, %v3491_v25 }
 0x3dc   : > { %939 = vmatprep.mubr.f32.mxu1 %v3986_v5 }
 0x3df   : > { %3500 = vmatmul.mubr.msk.f32.gmra.mrb[14].mxu1 %vm455_vm2, %v3492_v26  ;;  %v1074_v26 = vpop.permute.xlu1 %1073 }
 0x3e0   : > { %1168 = vmatprep.mubr.f32.mxu1 %v3986_v5 }
 0x4a6   : > { %v923_v27 = vpop.f32.mrb[8].mxu1 }
 0x4a7   : > { %v925_v28 = vpop.f32.mrb[9].mxu1  ;;  %v924_v30 = vadd.f32 %v923_v27, %v828_v29 }
 0x4a8   : > { %v926_v34 = vadd.f32 %v925_v28, %v828_v29 }
 0x4a9   : > { %v946_v39 = vmax.f32 %v924_v30, 0.0 }
 0x4aa   : > { %v929_v35 = vpop.f32.mrb[10].mxu1  ;;  %v947_v41 = vmax.f32 %v926_v34, 0.0 }
 0x4ab   : > { %v930_v36 = vadd.f32 %v929_v35, %v833_v31  ;;  %v931_v37 = vpop.f32.mrb[11].mxu1 }
 0x4ac   : > { %v932_v38 = vadd.f32 %v931_v37, %v833_v31 }
 0x4ad   : > { %v948_v40 = vmax.f32 %v930_v36, 0.0 }
 0x4ae   : > { %v949_v42 = vmax.f32 %v932_v38, 0.0  ;;  %v935_v43 = vpop.f32.mrb[12].mxu1 }
 0x4af   : > { %v3710_v44 = vpack.c.bf16 %v948_v40, %v946_v39  ;;  %v937_v45 = vpop.f32.mrb[13].mxu1  ;;  %v936_v50 = vadd.f32 %v935_v43, %v838_v48 }
 0x4b0   : > { %v3708_v49 = vpack.c.bf16 %v949_v42, %v947_v41  ;;  %v938_v52 = vadd.f32 %v937_v45, %v838_v48  ;;  %v1079_v41 = vpop.permute.xlu0 %1078 }
 0x4b1   : > { %v950_v57 = vmax.f32 %v936_v50, 0.0 }
 0x4b2   : > { %v941_v53 = vpop.f32.mrb[14].mxu1  ;;  %3709 = vmatprep.subr.bf16.mxu0 %v3708_v49  ;;  %v951_v59 = vmax.f32 %v938_v52, 0.0 }
 0x4b3   : > { %v942_v54 = vadd.f32 %v941_v53, %v843_v51  ;;  %v943_v55 = vpop.f32.mrb[15].mxu1  ;;  %3711 = vmatpush1.bf16.msra.mxu0 %v3710_v44  ;;  %v1084_v44 = vpop.permute.xlu1 %1083 }
 0x4b4   : > { %v944_v56 = vadd.f32 %v943_v55, %v843_v51 }
 0x4b5   : > { %v952_v58 = vmax.f32 %v942_v54, 0.0 }
 0x4b6   : > { %v953_v60 = vmax.f32 %v944_v56, 0.0 }
 0x4b7   : > { %v3714_v61 = vpack.c.bf16 %v952_v58, %v950_v57  ;;  %v3518_v58 = vld [vmem:[%s4840_s3 + $0x40] sm:$0xff] }
 0x4b8   : > { %v3712_v62 = vpack.c.bf16 %v953_v60, %v951_v59  ;;  %v3519_v59 = vld [vmem:[%s4840_s3 + $0x48] sm:$0xff]  ;;  %v3520_v60 = vld [vmem:[%s4840_s3 + $0x50] sm:$0xff] }
 0x4ba   : > { %3713 = vmatprep.subr.bf16.mxu0 %v3712_v62 }
 0x4bb   : > { %3715 = vmatpush1.bf16.msra.mxu0 %v3714_v61  ;;  %v3521_v61 = vld [vmem:[%s4840_s3 + $0x58] sm:$0xff] }
 0x4be   : > { %3503 = vmatmul.mubr.msk.f32.vlgmr.msra.gmra.mrb[18].mxu0 %vm455_vm2, %v3501_v63 }
 0x4bf   : > { %1307 = vmatprep.mubr.f32.mxu0 %v3986_v5 }
 0x591   : > { %v1032_v1 = vpop.f32.mrb[18].mxu0 }
 0x592   : > { %v1033_v2 = vadd.f32 %v1032_v1, %v961_v0  ;;  %v1034_v3 = vpop.f32.mrb[19].mxu0 }
 0x593   : > { %v1035_v4 = vadd.f32 %v1034_v3, %v961_v0  ;;  %v1214_v0 = vpop.permute.xlu0 %1213 }
 0x594   : > { %3865 = vtanh.f32 %v1033_v2  ;;  %v1048_v17 = vrot.slane %v1033_v2, 2  ;;  %v1219_v2 = vpop.permute.xlu1 %1218 }
 0x595   : > { %3867 = vtanh.f32 %v1035_v4  ;;  %v1049_v16 = vrot.slane %v1035_v4, 2 }
 0x59e   : > { %v4416_v6 = vpop.eup %3865 }
 0x59f   : > { %v4418_v7 = vpop.eup %3867  ;;  %v1039_v10 = vmul.f32 1.442695, %v4416_v6 }
 0x5a0   : > { %v1041_v11 = vmul.f32 1.442695, %v4418_v7 }
 0x5a1   : > { %3869 = vpow2.f32 %v1039_v10 }
 0x5a2   : > { %3871 = vpow2.f32 %v1041_v11 }
 0x5ab   : > { %v3870_v12 = vpop.eup %3869 }
 0x5ac   : > { %v3872_v13 = vpop.eup %3871  ;;  %v1044_v14 = vmul.f32 %v3870_v12, %v4103_v8  ;;  %v3505_v8 = vld [vmem:[%s4838_s1 + $0x48] sm:$0xff] }
 0x5ad   : > { %v1045_v15 = vmul.f32 %v3872_v13, %v4107_v9  ;;  %v3506_v9 = vld [vmem:[%s4838_s1 + $0x50] sm:$0xff] }
 0x5ae   : > { %v4426_v19 = vadd.f32 %v1048_v17, %v1044_v14 }
 0x5af   : > { %v4424_v18 = vadd.f32 %v1049_v16, %v1045_v15 }
 0x5b1   : > { %3512 = vmatprep.subr.msk.mxu1 %vm325_vm0, %v4424_v18 }
 0x5b2   : > { %3513 = vmatpush1.msk.msra.mxu1 %vm325_vm0, %v4426_v19 }
 0x5b3   : > { %3514 = vmatmul.mubr.msk.f32.vlgmr.msra.gmra.mrb[16].mxu1 %vm312_vm1, %v3504_v20 }
 0x5b4   : > { %1174 = vmatprep.mubr.f32.mxu1 %v3986_v5 }
 0x5b7   : > { %3515 = vmatmul.mubr.msk.f32.gmra.mrb[18].mxu1 %vm312_vm1, %v3505_v8 }
 0x5b8   : > { %1180 = vmatprep.mubr.f32.mxu1 %v3986_v5 }
 0x5bb   : > { %3516 = vmatmul.mubr.msk.f32.gmra.mrb[20].mxu1 %vm312_vm1, %v3506_v9  ;;  %v1224_v9 = vpop.permute.xlu0 %1223 }
 0x5bc   : > { %1186 = vmatprep.mubr.f32.mxu1 %v3986_v5 }
 0x5bf   : > { %3517 = vmatmul.mubr.msk.f32.gmra.mrb[22].mxu1 %vm312_vm1, %v3507_v21 }
 0x5c0   : > { %1416 = vmatprep.mubr.f32.mxu1 %v3986_v5 }
 0x686   : > { %v1170_v22 = vpop.f32.mrb[16].mxu1 }
 0x687   : > { %v1172_v23 = vpop.f32.mrb[17].mxu1  ;;  %v1171_v25 = vadd.f32 %v1170_v22, %v1069_v24 }
 0x688   : > { %v1173_v27 = vadd.f32 %v1172_v23, %v1069_v24  ;;  %v1229_v23 = vpop.permute.xlu1 %1228 }
 0x689   : > { %v1193_v34 = vmax.f32 %v1171_v25, 0.0 }
 0x68a   : > { %v1176_v28 = vpop.f32.mrb[18].mxu1  ;;  %v1194_v36 = vmax.f32 %v1173_v27, 0.0 }
 0x68b   : > { %v1177_v29 = vadd.f32 %v1176_v28, %v1074_v26  ;;  %v1178_v30 = vpop.f32.mrb[19].mxu1 }
 0x68c   : > { %v1179_v31 = vadd.f32 %v1178_v30, %v1074_v26 }
 0x68d   : > { %v1195_v35 = vmax.f32 %v1177_v29, 0.0 }
 0x68e   : > { %v1196_v37 = vmax.f32 %v1179_v31, 0.0  ;;  %v1182_v38 = vpop.f32.mrb[20].mxu1 }
 0x68f   : > { %v3718_v39 = vpack.c.bf16 %v1195_v35, %v1193_v34  ;;  %v1184_v40 = vpop.f32.mrb[21].mxu1  ;;  %v1183_v43 = vadd.f32 %v1182_v38, %v1079_v41  ;;  %v1347_v38 = vpop.permute.xlu0 %1346 }
 0x690   : > { %v3716_v42 = vpack.c.bf16 %v1196_v37, %v1194_v36  ;;  %v1185_v45 = vadd.f32 %v1184_v40, %v1079_v41  ;;  %v3530_v37 = vld [vmem:[%s4842_s5 + $0x8] sm:$0xf] }
 0x691   : > { %v1197_v52 = vmax.f32 %v1183_v43, 0.0  ;;  %v1054_v43 = vadd.f32 %v4416_v6, %v4356_v32 }
 0x692   : > { %v1188_v48 = vpop.f32.mrb[22].mxu1  ;;  %3717 = vmatprep.subr.bf16.mxu0 %v3716_v42  ;;  %v1198_v54 = vmax.f32 %v1185_v45, 0.0  ;;  %v1055_v45 = vadd.f32 %v4418_v7, %v4358_v33  ;;  %v3533_v7 = vld [vmem:[%s4838_s1 + $0x60] sm:$0xff] }
 0x693   : > { %v1189_v49 = vadd.f32 %v1188_v48, %v1084_v44  ;;  %v1190_v50 = vpop.f32.mrb[23].mxu1  ;;  %3719 = vmatpush1.bf16.msra.mxu0 %v3718_v39 }
 0x694   : > { %v1191_v51 = vadd.f32 %v1190_v50, %v1084_v44 }
 0x695   : > { %v1199_v53 = vmax.f32 %v1189_v49, 0.0 }
 0x696   : > { %v1200_v55 = vmax.f32 %v1191_v51, 0.0 }
 0x697   : > { %v3722_v56 = vpack.c.bf16 %v1199_v53, %v1197_v52 }
 0x698   : > { %v3720_v57 = vpack.c.bf16 %v1200_v55, %v1198_v54 }
 0x69a   : > { %3721 = vmatprep.subr.bf16.mxu0 %v3720_v57 }
 0x69b   : > { %3723 = vmatpush1.bf16.msra.mxu0 %v3722_v56 }
 0x69e   : > { %3526 = vmatmul.mubr.msk.f32.vlgmr.msra.gmra.mrb[20].mxu0 %vm455_vm2, %v3518_v58  ;;  %v3536_v58 = vld [vmem:[%s4838_s1 + $0x78] sm:$0xff] }
 0x69f   : > { %1313 = vmatprep.mubr.f32.mxu0 %v3986_v5 }
 0x6a2   : > { %3527 = vmatmul.mubr.msk.f32.gmra.mrb[22].mxu0 %vm455_vm2, %v3519_v59 }
 0x6a3   : > { %1319 = vmatprep.mubr.f32.mxu0 %v3986_v5 }
 0x6a6   : > { %3528 = vmatmul.mubr.msk.f32.gmra.mrb[24].mxu0 %vm455_vm2, %v3520_v60 }
 0x6a7   : > { %1325 = vmatprep.mubr.f32.mxu0 %v3986_v5 }
 0x6aa   : > { %3529 = vmatmul.mubr.msk.f32.gmra.mrb[26].mxu0 %vm455_vm2, %v3521_v61  ;;  %v1454_v61 = vpop.permute.xlu1 %1453 }
 0x6ab   : > { %1692 = vmatprep.mubr.f32.mxu0 %v3986_v5 }
 0x771   : > { %v1309_v62 = vpop.f32.mrb[20].mxu0 }
 0x772   : > { %v1311_v63 = vpop.f32.mrb[21].mxu0  ;;  %v1310_v1 = vadd.f32 %v1309_v62, %v1214_v0 }
 0x773   : > { %v1312_v3 = vadd.f32 %v1311_v63, %v1214_v0  ;;  %v1459_v63 = vpop.permute.xlu0 %1458 }
 0x774   : > { %v1332_v13 = vmax.f32 %v1310_v1, 0.0 }
 0x775   : > { %v1315_v4 = vpop.f32.mrb[22].mxu0  ;;  %v1333_v15 = vmax.f32 %v1312_v3, 0.0 }
 0x776   : > { %v1316_v10 = vadd.f32 %v1315_v4, %v1219_v2  ;;  %v1317_v11 = vpop.f32.mrb[23].mxu0 }
 0x777   : > { %v1318_v12 = vadd.f32 %v1317_v11, %v1219_v2 }
 0x778   : > { %v1334_v14 = vmax.f32 %v1316_v10, 0.0 }
 0x779   : > { %v1335_v16 = vmax.f32 %v1318_v12, 0.0  ;;  %v1321_v17 = vpop.f32.mrb[24].mxu0 }
 0x77a   : > { %v3726_v20 = vpack.c.bf16 %v1334_v14, %v1332_v13  ;;  %v1323_v8 = vpop.f32.mrb[25].mxu0  ;;  %v1322_v22 = vadd.f32 %v1321_v17, %v1224_v9  ;;  %v1464_v17 = vpop.permute.xlu1 %1463 }
 0x77b   : > { %v3724_v21 = vpack.c.bf16 %v1335_v16, %v1333_v15  ;;  %v1324_v24 = vadd.f32 %v1323_v8, %v1224_v9  ;;  %v1469_v9 = vpop.permute.xlu0 %1468 }
 0x77c   : > { %v1336_v29 = vmax.f32 %v1322_v22, 0.0 }
 0x77d   : > { %v1327_v25 = vpop.f32.mrb[26].mxu0  ;;  %3725 = vmatprep.subr.bf16.mxu1 %v3724_v21  ;;  %v1337_v31 = vmax.f32 %v1324_v24, 0.0 }
 0x77e   : > { %v1328_v26 = vadd.f32 %v1327_v25, %v1229_v23  ;;  %v1329_v27 = vpop.f32.mrb[27].mxu0  ;;  %3727 = vmatpush1.bf16.msra.mxu1 %v3726_v20 }
 0x77f   : > { %v1330_v28 = vadd.f32 %v1329_v27, %v1229_v23 }
 0x780   : > { %v1338_v30 = vmax.f32 %v1328_v26, 0.0 }
 0x781   : > { %v1339_v34 = vmax.f32 %v1330_v28, 0.0 }
 0x782   : > { %v3730_v35 = vpack.c.bf16 %v1338_v30, %v1336_v29 }
 0x783   : > { %v3728_v36 = vpack.c.bf16 %v1339_v34, %v1337_v31  ;;  %v3547_v34 = vld [vmem:[%s4840_s3 + $0x60] sm:$0xff] }
 0x785   : > { %3729 = vmatprep.subr.bf16.mxu1 %v3728_v36  ;;  %v3549_v36 = vld [vmem:[%s4840_s3 + $0x70] sm:$0xff] }
 0x786   : > { %3731 = vmatpush1.bf16.msra.mxu1 %v3730_v35  ;;  %v3548_v35 = vld [vmem:[%s4840_s3 + $0x68] sm:$0xff] }
 0x789   : > { %3532 = vmatmul.mubr.msk.f32.vlgmr.msra.gmra.mrb[24].mxu1 %vm455_vm2, %v3530_v37  ;;  %v3550_v37 = vld [vmem:[%s4840_s3 + $0x78] sm:$0xff] }
 0x78a   : > { %1553 = vmatprep.mubr.f32.mxu1 %v3986_v5 }
 0x85c   : > { %v1418_v39 = vpop.f32.mrb[24].mxu1 }
 0x85d   : > { %v1419_v40 = vadd.f32 %v1418_v39, %v1347_v38  ;;  %v1420_v41 = vpop.f32.mrb[25].mxu1 }
 0x85e   : > { %v1421_v42 = vadd.f32 %v1420_v41, %v1347_v38 }
 0x85f   : > { %3873 = vtanh.f32 %v1419_v40  ;;  %v1433_v6 = vrot.slane %v1419_v40, 2  ;;  %v1599_v40 = vpop.permute.xlu1 %1598 }
 0x860   : > { %3875 = vtanh.f32 %v1421_v42  ;;  %v1434_v32 = vrot.slane %v1421_v42, 2  ;;  %v1604_v42 = vpop.permute.xlu0 %1603 }
 0x869   : > { %v3874_v44 = vpop.eup %3873 }
 0x86a   : > { %v3876_v48 = vpop.eup %3875  ;;  %v1425_v49 = vmul.f32 1.442695, %v3874_v44  ;;  %v4481_v50 = vadd.f32 %v3874_v44, %v1054_v43 }
 0x86b   : > { %v1427_v51 = vmul.f32 1.442695, %v3876_v48  ;;  %v4483_v52 = vadd.f32 %v3876_v48, %v1055_v45 }
 0x86c   : > { %3877 = vpow2.f32 %v1425_v49 }
 0x86d   : > { %3879 = vpow2.f32 %v1427_v51 }
 0x876   : > { %v3878_v53 = vpop.eup %3877 }
 0x877   : > { %v3880_v54 = vpop.eup %3879  ;;  %v1429_v55 = vmul.f32 %v3878_v53, %v4363_v46  ;;  %v3534_v46 = vld [vmem:[%s4838_s1 + $0x68] sm:$0xff] }
 0x878   : > { %v1430_v56 = vmul.f32 %v3880_v54, %v4365_v47  ;;  %v3535_v47 = vld [vmem:[%s4838_s1 + $0x70] sm:$0xff] }
 0x879   : > { %v4489_v33 = vadd.f32 %v1433_v6, %v1429_v55 }
 0x87a   : > { %v4487_v57 = vadd.f32 %v1434_v32, %v1430_v56 }
 0x87c   : > { %3541 = vmatprep.subr.msk.mxu1 %vm325_vm0, %v4487_v57 }
 0x87d   : > { %3542 = vmatpush1.msk.msra.mxu1 %vm325_vm0, %v4489_v33 }
 0x87e   : > { %3543 = vmatmul.mubr.msk.f32.vlgmr.msra.gmra.mrb[26].mxu1 %vm312_vm1, %v3533_v7  ;;  %v1609_v7 = vpop.permute.xlu1 %1608 }
 0x87f   : > { %1559 = vmatprep.mubr.f32.mxu1 %v3986_v5 }
 0x882   : > { %3544 = vmatmul.mubr.msk.f32.gmra.mrb[28].mxu1 %vm312_vm1, %v3534_v46 }
 0x883   : > { %1565 = vmatprep.mubr.f32.mxu1 %v3986_v5 }
 0x886   : > { %3545 = vmatmul.mubr.msk.f32.gmra.mrb[30].mxu1 %vm312_vm1, %v3535_v47 }
 0x887   : > { %1571 = vmatprep.mubr.f32.mxu1 %v3986_v5 }
 0x88a   : > { %3546 = vmatmul.mubr.msk.f32.gmra.mrb[32].mxu1 %vm312_vm1, %v3536_v58  ;;  %v1614_v58 = vpop.permute.xlu0 %1613 }
 0x88b   : > { %1801 = vmatprep.mubr.f32.mxu1 %v3986_v5 }
 0x951   : > { %v1555_v59 = vpop.f32.mrb[26].mxu1 }
 0x952   : > { %v1557_v60 = vpop.f32.mrb[27].mxu1  ;;  %v1556_v62 = vadd.f32 %v1555_v59, %v1454_v61 }
 0x953   : > { %v1558_v0 = vadd.f32 %v1557_v60, %v1454_v61 }
 0x954   : > { %v1578_v10 = vmax.f32 %v1556_v62, 0.0 }
 0x955   : > { %v1561_v1 = vpop.f32.mrb[28].mxu1  ;;  %v1579_v12 = vmax.f32 %v1558_v0, 0.0 }
 0x956   : > { %v1562_v2 = vadd.f32 %v1561_v1, %v1459_v63  ;;  %v1563_v3 = vpop.f32.mrb[29].mxu1 }
 0x957   : > { %v1564_v4 = vadd.f32 %v1563_v3, %v1459_v63 }
 0x958   : > { %v1580_v11 = vmax.f32 %v1562_v2, 0.0 }
 0x959   : > { %v1581_v13 = vmax.f32 %v1564_v4, 0.0  ;;  %v1567_v14 = vpop.f32.mrb[30].mxu1 }
 0x95a   : > { %v3734_v15 = vpack.c.bf16 %v1580_v11, %v1578_v10  ;;  %v1569_v16 = vpop.f32.mrb[31].mxu1  ;;  %v1568_v8 = vadd.f32 %v1567_v14, %v1464_v17  ;;  %v3559_v11 = vld [vmem:[%s4842_s5 + $0xc] sm:$0xf] }
 0x95b   : > { %v3732_v20 = vpack.c.bf16 %v1581_v13, %v1579_v12  ;;  %v1570_v21 = vadd.f32 %v1569_v16, %v1464_v17  ;;  %v1732_v12 = vpop.permute.xlu1 %1731 }
 0x95c   : > { %v1582_v26 = vmax.f32 %v1568_v8, 0.0 }
 0x95d   : > { %v1573_v22 = vpop.f32.mrb[32].mxu1  ;;  %3733 = vmatprep.subr.bf16.mxu0 %v3732_v20  ;;  %v1583_v28 = vmax.f32 %v1570_v21, 0.0 }
 0x95e   : > { %v1574_v23 = vadd.f32 %v1573_v22, %v1469_v9  ;;  %v1575_v24 = vpop.f32.mrb[33].mxu1  ;;  %3735 = vmatpush1.bf16.msra.mxu0 %v3734_v15 }
 0x95f   : > { %v1576_v25 = vadd.f32 %v1575_v24, %v1469_v9 }
 0x960   : > { %v1584_v27 = vmax.f32 %v1574_v23, 0.0 }
 0x961   : > { %v1585_v29 = vmax.f32 %v1576_v25, 0.0 }
 0x962   : > { %v3738_v30 = vpack.c.bf16 %v1584_v27, %v1582_v26 }
 0x963   : > { %v3736_v31 = vpack.c.bf16 %v1585_v29, %v1583_v28 }
 0x965   : > { %3737 = vmatprep.subr.bf16.mxu0 %v3736_v31 }
 0x966   : > { %3739 = vmatpush1.bf16.msra.mxu0 %v3738_v30 }
 0x969   : > { %3555 = vmatmul.mubr.msk.f32.vlgmr.msra.gmra.mrb[28].mxu0 %vm455_vm2, %v3547_v34 }
 0x96a   : > { %1698 = vmatprep.mubr.f32.mxu0 %v3986_v5 }
 0x96d   : > { %3556 = vmatmul.mubr.msk.f32.gmra.mrb[30].mxu0 %vm455_vm2, %v3548_v35  ;;  %v1839_v35 = vpop.permute.xlu0 %1838 }
 0x96e   : > { %1704 = vmatprep.mubr.f32.mxu0 %v3986_v5 }
 0x971   : > { %3557 = vmatmul.mubr.msk.f32.gmra.mrb[32].mxu0 %vm455_vm2, %v3549_v36 }
 0x972   : > { %1710 = vmatprep.mubr.f32.mxu0 %v3986_v5 }
 0x975   : > { %3558 = vmatmul.mubr.msk.f32.gmra.mrb[34].mxu0 %vm455_vm2, %v3550_v37  ;;  %v1844_v37 = vpop.permute.xlu1 %1843 }
 0x976   : > { %1938 = vmatprep.mubr.f32.mxu0 %v3986_v5 }
 0xa3c   : > { %v1694_v38 = vpop.f32.mrb[28].mxu0 }
 0xa3d   : > { %v1696_v39 = vpop.f32.mrb[29].mxu0  ;;  %v1695_v41 = vadd.f32 %v1694_v38, %v1599_v40 }
 0xa3e   : > { %v1697_v43 = vadd.f32 %v1696_v39, %v1599_v40 }
 0xa3f   : > { %v1717_v51 = vmax.f32 %v1695_v41, 0.0 }
 0xa40   : > { %v1700_v44 = vpop.f32.mrb[30].mxu0  ;;  %v1718_v54 = vmax.f32 %v1697_v43, 0.0 }
 0xa41   : > { %v1701_v45 = vadd.f32 %v1700_v44, %v1604_v42  ;;  %v1702_v48 = vpop.f32.mrb[31].mxu0 }
 0xa42   : > { %v1703_v49 = vadd.f32 %v1702_v48, %v1604_v42 }
 0xa43   : > { %v1719_v53 = vmax.f32 %v1701_v45, 0.0 }
 0xa44   : > { %v1720_v55 = vmax.f32 %v1703_v49, 0.0  ;;  %v1706_v56 = vpop.f32.mrb[32].mxu0 }
 0xa45   : > { %v3742_v32 = vpack.c.bf16 %v1719_v53, %v1717_v51  ;;  %v1708_v6 = vpop.f32.mrb[33].mxu0  ;;  %v1707_v47 = vadd.f32 %v1706_v56, %v1609_v7 }
 0xa46   : > { %v3740_v46 = vpack.c.bf16 %v1720_v55, %v1718_v54  ;;  %v1709_v59 = vadd.f32 %v1708_v6, %v1609_v7  ;;  %v1849_v54 = vpop.permute.xlu0 %1848 }
 0xa47   : > { %v1721_v0 = vmax.f32 %v1707_v47, 0.0 }
 0xa48   : > { %v1712_v60 = vpop.f32.mrb[34].mxu0  ;;  %3741 = vmatprep.subr.bf16.mxu1 %v3740_v46  ;;  %v1722_v2 = vmax.f32 %v1709_v59, 0.0 }
 0xa49   : > { %v1713_v61 = vadd.f32 %v1712_v60, %v1614_v58  ;;  %v1714_v62 = vpop.f32.mrb[35].mxu0  ;;  %3743 = vmatpush1.bf16.msra.mxu1 %v3742_v32  ;;  %v1854_v32 = vpop.permute.xlu1 %1853 }
 0xa4a   : > { %v1715_v63 = vadd.f32 %v1714_v62, %v1614_v58 }
 0xa4b   : > { %v1723_v1 = vmax.f32 %v1713_v61, 0.0 }
 0xa4c   : > { %v1724_v3 = vmax.f32 %v1715_v63, 0.0 }
 0xa4d   : > { %v3746_v4 = vpack.c.bf16 %v1723_v1, %v1721_v0  ;;  %v3576_v1 = vld [vmem:[%s4840_s3 + $0x80] sm:$0xff] }
 0xa4e   : > { %v3744_v10 = vpack.c.bf16 %v1724_v3, %v1722_v2  ;;  %v3577_v2 = vld [vmem:[%s4840_s3 + $0x88] sm:$0xff]  ;;  %v3578_v3 = vld [vmem:[%s4840_s3 + $0x90] sm:$0xff] }
 0xa50   : > { %3745 = vmatprep.subr.bf16.mxu1 %v3744_v10 }
 0xa51   : > { %3747 = vmatpush1.bf16.msra.mxu1 %v3746_v4  ;;  %v3579_v4 = vld [vmem:[%s4840_s3 + $0x98] sm:$0xff] }
 0xa54   : > { %3561 = vmatmul.mubr.msk.f32.vlgmr.msra.gmra.mrb[34].mxu1 %vm455_vm2, %v3559_v11 }
 0xa55   : > { %2077 = vmatprep.mubr.f32.mxu1 %v3986_v5 }
 0xb27   : > { %v1803_v13 = vpop.f32.mrb[34].mxu1 }
 0xb28   : > { %v1804_v14 = vadd.f32 %v1803_v13, %v1732_v12  ;;  %v1805_v15 = vpop.f32.mrb[35].mxu1 }
 0xb29   : > { %v1806_v16 = vadd.f32 %v1805_v15, %v1732_v12  ;;  %v1984_v12 = vpop.permute.xlu0 %1983 }
 0xb2a   : > { %3881 = vtanh.f32 %v1804_v14  ;;  %v1818_v28 = vrot.slane %v1804_v14, 2  ;;  %v1989_v14 = vpop.permute.xlu1 %1988 }
 0xb2b   : > { %3883 = vtanh.f32 %v1806_v16  ;;  %v1819_v27 = vrot.slane %v1806_v16, 2 }
 0xb34   : > { %v3882_v17 = vpop.eup %3881 }
 0xb35   : > { %v3884_v20 = vpop.eup %3883  ;;  %v1810_v8 = vmul.f32 1.442695, %v3882_v17  ;;  %v4541_v9 = vadd.f32 %v3882_v17, %v4481_v50  ;;  %v3562_v50 = vld [vmem:[%s4838_s1 + $0x80] sm:$0xff] }
 0xb36   : > { %v1812_v21 = vmul.f32 1.442695, %v3884_v20  ;;  %v4544_v22 = vadd.f32 %v3884_v20, %v4483_v52  ;;  %v3565_v52 = vld [vmem:[%s4838_s1 + $0x98] sm:$0xff] }
 0xb37   : > { %3885 = vpow2.f32 %v1810_v8 }
 0xb38   : > { %3887 = vpow2.f32 %v1812_v21 }
 0xb41   : > { %v3886_v23 = vpop.eup %3885 }
 0xb42   : > { %v3888_v24 = vpop.eup %3887  ;;  %v1814_v25 = vmul.f32 %v3886_v23, %v4426_v19  ;;  %v3564_v19 = vld [vmem:[%s4838_s1 + $0x90] sm:$0xff] }
 0xb43   : > { %v1815_v26 = vmul.f32 %v3888_v24, %v4424_v18  ;;  %v3563_v18 = vld [vmem:[%s4838_s1 + $0x88] sm:$0xff] }
 0xb44   : > { %v4550_v30 = vadd.f32 %v1818_v28, %v1814_v25 }
 0xb45   : > { %v4548_v29 = vadd.f32 %v1819_v27, %v1815_v26 }
 0xb47   : > { %3570 = vmatprep.subr.msk.mxu0 %vm325_vm0, %v4548_v29 }
 0xb48   : > { %3571 = vmatpush1.msk.msra.mxu0 %vm325_vm0, %v4550_v30 }
 0xb49   : > { %3572 = vmatmul.mubr.msk.f32.vlgmr.msra.gmra.mrb[36].mxu0 %vm312_vm1, %v3562_v50  ;;  %v1994_v50 = vpop.permute.xlu0 %1993 }
 0xb4a   : > { %1944 = vmatprep.mubr.f32.mxu0 %v3986_v5 }
 0xb4d   : > { %3573 = vmatmul.mubr.msk.f32.gmra.mrb[38].mxu0 %vm312_vm1, %v3563_v18 }
 0xb4e   : > { %1950 = vmatprep.mubr.f32.mxu0 %v3986_v5 }
 0xb51   : > { %3574 = vmatmul.mubr.msk.f32.gmra.mrb[40].mxu0 %vm312_vm1, %v3564_v19 }
 0xb52   : > { %1956 = vmatprep.mubr.f32.mxu0 %v3986_v5 }
 0xb55   : > { %3575 = vmatmul.mubr.msk.f32.gmra.mrb[42].mxu0 %vm312_vm1, %v3565_v52  ;;  %v1999_v52 = vpop.permute.xlu1 %1998 }
 0xb56   : > { %2186 = vmatprep.mubr.f32.mxu0 %v3986_v5 }
 0xc1c   : > { %v1940_v31 = vpop.f32.mrb[36].mxu0 }
 0xc1d   : > { %v1942_v34 = vpop.f32.mrb[37].mxu0  ;;  %v1941_v36 = vadd.f32 %v1940_v31, %v1839_v35 }
 0xc1e   : > { %v1943_v38 = vadd.f32 %v1942_v34, %v1839_v35 }
 0xc1f   : > { %v1963_v43 = vmax.f32 %v1941_v36, 0.0 }
 0xc20   : > { %v1946_v39 = vpop.f32.mrb[38].mxu0  ;;  %v1964_v45 = vmax.f32 %v1943_v38, 0.0 }
 0xc21   : > { %v1947_v40 = vadd.f32 %v1946_v39, %v1844_v37  ;;  %v1948_v41 = vpop.f32.mrb[39].mxu0 }
 0xc22   : > { %v1949_v42 = vadd.f32 %v1948_v41, %v1844_v37 }
 0xc23   : > { %v1965_v44 = vmax.f32 %v1947_v40, 0.0 }
 0xc24   : > { %v1966_v48 = vmax.f32 %v1949_v42, 0.0  ;;  %v1952_v49 = vpop.f32.mrb[40].mxu0 }
 0xc25   : > { %v3750_v51 = vpack.c.bf16 %v1965_v44, %v1963_v43  ;;  %v1954_v53 = vpop.f32.mrb[41].mxu0  ;;  %v1953_v56 = vadd.f32 %v1952_v49, %v1849_v54  ;;  %v3588_v44 = vld [vmem:[%s4842_s5 + $0x10] sm:$0xf] }
 0xc26   : > { %v3748_v55 = vpack.c.bf16 %v1966_v48, %v1964_v45  ;;  %v1955_v6 = vadd.f32 %v1954_v53, %v1849_v54  ;;  %v2117_v45 = vpop.permute.xlu0 %2116 }
 0xc27   : > { %v1967_v59 = vmax.f32 %v1953_v56, 0.0 }
 0xc28   : > { %v1958_v7 = vpop.f32.mrb[42].mxu0  ;;  %3749 = vmatprep.subr.bf16.mxu1 %v3748_v55  ;;  %v1968_v61 = vmax.f32 %v1955_v6, 0.0 }
 0xc29   : > { %v1959_v46 = vadd.f32 %v1958_v7, %v1854_v32  ;;  %v1960_v47 = vpop.f32.mrb[43].mxu0  ;;  %3751 = vmatpush1.bf16.msra.mxu1 %v3750_v51 }
 0xc2a   : > { %v1961_v58 = vadd.f32 %v1960_v47, %v1854_v32 }
 0xc2b   : > { %v1969_v60 = vmax.f32 %v1959_v46, 0.0 }
 0xc2c   : > { %v1970_v62 = vmax.f32 %v1961_v58, 0.0 }
 0xc2d   : > { %v3754_v63 = vpack.c.bf16 %v1969_v60, %v1967_v59 }
 0xc2e   : > { %v3752_v0 = vpack.c.bf16 %v1970_v62, %v1968_v61 }
 0xc30   : > { %3753 = vmatprep.subr.bf16.mxu1 %v3752_v0 }
 0xc31   : > { %3755 = vmatpush1.bf16.msra.mxu1 %v3754_v63 }
 0xc34   : > { %3584 = vmatmul.mubr.msk.f32.vlgmr.msra.gmra.mrb[36].mxu1 %vm455_vm2, %v3576_v1 }
 0xc35   : > { %2083 = vmatprep.mubr.f32.mxu1 %v3986_v5 }
 0xc38   : > { %3585 = vmatmul.mubr.msk.f32.gmra.mrb[38].mxu1 %vm455_vm2, %v3577_v2  ;;  %v2224_v2 = vpop.permute.xlu1 %2223 }
 0xc39   : > { %2089 = vmatprep.mubr.f32.mxu1 %v3986_v5 }
 0xc3c   : > { %3586 = vmatmul.mubr.msk.f32.gmra.mrb[40].mxu1 %vm455_vm2, %v3578_v3 }
 0xc3d   : > { %2095 = vmatprep.mubr.f32.mxu1 %v3986_v5 }
 0xc40   : > { %3587 = vmatmul.mubr.msk.f32.gmra.mrb[42].mxu1 %vm455_vm2, %v3579_v4  ;;  %v2229_v4 = vpop.permute.xlu0 %2228 }
 0xc41   : > { %2462 = vmatprep.mubr.f32.mxu1 %v3986_v5 }
 0xd07   : > { %v2079_v10 = vpop.f32.mrb[36].mxu1 }
 0xd08   : > { %v2081_v11 = vpop.f32.mrb[37].mxu1  ;;  %v2080_v13 = vadd.f32 %v2079_v10, %v1984_v12 }
 0xd09   : > { %v2082_v15 = vadd.f32 %v2081_v11, %v1984_v12 }
 0xd0a   : > { %v2102_v21 = vmax.f32 %v2080_v13, 0.0 }
 0xd0b   : > { %v2085_v16 = vpop.f32.mrb[38].mxu1  ;;  %v2103_v24 = vmax.f32 %v2082_v15, 0.0 }
 0xd0c   : > { %v2086_v17 = vadd.f32 %v2085_v16, %v1989_v14  ;;  %v2087_v20 = vpop.f32.mrb[39].mxu1 }
 0xd0d   : > { %v2088_v8 = vadd.f32 %v2087_v20, %v1989_v14 }
 0xd0e   : > { %v2104_v23 = vmax.f32 %v2086_v17, 0.0 }
 0xd0f   : > { %v2105_v25 = vmax.f32 %v2088_v8, 0.0  ;;  %v2091_v26 = vpop.f32.mrb[40].mxu1 }
 0xd10   : > { %v3758_v27 = vpack.c.bf16 %v2104_v23, %v2102_v21  ;;  %v2093_v28 = vpop.f32.mrb[41].mxu1  ;;  %v2092_v19 = vadd.f32 %v2091_v26, %v1994_v50 }
 0xd11   : > { %v3756_v18 = vpack.c.bf16 %v2105_v25, %v2103_v24  ;;  %v2094_v31 = vadd.f32 %v2093_v28, %v1994_v50  ;;  %v2234_v24 = vpop.permute.xlu1 %2233 }
 0xd12   : > { %v2106_v38 = vmax.f32 %v2092_v19, 0.0 }
 0xd13   : > { %v2097_v34 = vpop.f32.mrb[42].mxu1  ;;  %3757 = vmatprep.subr.bf16.mxu0 %v3756_v18  ;;  %v2107_v40 = vmax.f32 %v2094_v31, 0.0 }
 0xd14   : > { %v2098_v35 = vadd.f32 %v2097_v34, %v1999_v52  ;;  %v2099_v36 = vpop.f32.mrb[43].mxu1  ;;  %3759 = vmatpush1.bf16.msra.mxu0 %v3758_v27  ;;  %v2239_v27 = vpop.permute.xlu0 %2238 }
 0xd15   : > { %v2100_v37 = vadd.f32 %v2099_v36, %v1999_v52 }
 0xd16   : > { %v2108_v39 = vmax.f32 %v2098_v35, 0.0 }
 0xd17   : > { %v2109_v41 = vmax.f32 %v2100_v37, 0.0 }
 0xd18   : > { %v3762_v42 = vpack.c.bf16 %v2108_v39, %v2106_v38  ;;  %v3605_v39 = vld [vmem:[%s4840_s3 + $0xa0] sm:$0xff] }
 0xd19   : > { %v3760_v43 = vpack.c.bf16 %v2109_v41, %v2107_v40  ;;  %v3606_v40 = vld [vmem:[%s4840_s3 + $0xa8] sm:$0xff]  ;;  %v3607_v41 = vld [vmem:[%s4840_s3 + $0xb0] sm:$0xff] }
 0xd1b   : > { %3761 = vmatprep.subr.bf16.mxu0 %v3760_v43 }
 0xd1c   : > { %3763 = vmatpush1.bf16.msra.mxu0 %v3762_v42  ;;  %v3608_v42 = vld [vmem:[%s4840_s3 + $0xb8] sm:$0xff] }
 0xd1f   : > { %3590 = vmatmul.mubr.msk.f32.vlgmr.msra.gmra.mrb[44].mxu0 %vm455_vm2, %v3588_v44 }
 0xd20   : > { %2323 = vmatprep.mubr.f32.mxu0 %v3986_v5 }
 0xdf2   : > { %v2188_v48 = vpop.f32.mrb[44].mxu0 }
 0xdf3   : > { %v2189_v49 = vadd.f32 %v2188_v48, %v2117_v45  ;;  %v2190_v51 = vpop.f32.mrb[45].mxu0 }
 0xdf4   : > { %v2191_v53 = vadd.f32 %v2190_v51, %v2117_v45  ;;  %v2369_v45 = vpop.permute.xlu1 %2368 }
 0xdf5   : > { %3889 = vtanh.f32 %v2189_v49  ;;  %v2203_v61 = vrot.slane %v2189_v49, 2  ;;  %v2374_v49 = vpop.permute.xlu0 %2373 }
 0xdf6   : > { %3891 = vtanh.f32 %v2191_v53  ;;  %v2204_v60 = vrot.slane %v2191_v53, 2 }
 0xdff   : > { %v3890_v54 = vpop.eup %3889 }
 0xe00   : > { %v3892_v55 = vpop.eup %3891  ;;  %v2195_v56 = vmul.f32 1.442695, %v3890_v54  ;;  %v4602_v32 = vadd.f32 %v3890_v54, %v4541_v9  ;;  %v3591_v9 = vld [vmem:[%s4838_s1 + $0xa0] sm:$0xff] }
 0xe01   : > { %v2197_v6 = vmul.f32 1.442695, %v3892_v55  ;;  %v4605_v7 = vadd.f32 %v3892_v55, %v4544_v22  ;;  %v3594_v22 = vld [vmem:[%s4838_s1 + $0xb8] sm:$0xff] }
 0xe02   : > { %3893 = vpow2.f32 %v2195_v56 }
 0xe03   : > { %3895 = vpow2.f32 %v2197_v6 }
 0xe0c   : > { %v3894_v46 = vpop.eup %3893 }
 0xe0d   : > { %v3896_v47 = vpop.eup %3895  ;;  %v2199_v58 = vmul.f32 %v3894_v46, %v4489_v33  ;;  %v3593_v33 = vld [vmem:[%s4838_s1 + $0xb0] sm:$0xff] }
 0xe0e   : > { %v2200_v59 = vmul.f32 %v3896_v47, %v4487_v57  ;;  %v3592_v57 = vld [vmem:[%s4838_s1 + $0xa8] sm:$0xff] }
 0xe0f   : > { %v4611_v63 = vadd.f32 %v2203_v61, %v2199_v58 }
 0xe10   : > { %v4609_v62 = vadd.f32 %v2204_v60, %v2200_v59 }
 0xe12   : > { %3599 = vmatprep.subr.msk.mxu0 %vm325_vm0, %v4609_v62 }
 0xe13   : > { %3600 = vmatpush1.msk.msra.mxu0 %vm325_vm0, %v4611_v63 }
 0xe14   : > { %3601 = vmatmul.mubr.msk.f32.vlgmr.msra.gmra.mrb[46].mxu0 %vm312_vm1, %v3591_v9  ;;  %v2379_v9 = vpop.permute.xlu1 %2378 }
 0xe15   : > { %2329 = vmatprep.mubr.f32.mxu0 %v3986_v5 }
 0xe18   : > { %3602 = vmatmul.mubr.msk.f32.gmra.mrb[48].mxu0 %vm312_vm1, %v3592_v57 }
 0xe19   : > { %2335 = vmatprep.mubr.f32.mxu0 %v3986_v5 }
 0xe1c   : > { %3603 = vmatmul.mubr.msk.f32.gmra.mrb[50].mxu0 %vm312_vm1, %v3593_v33 }
 0xe1d   : > { %2341 = vmatprep.mubr.f32.mxu0 %v3986_v5 }
 0xe20   : > { %3604 = vmatmul.mubr.msk.f32.gmra.mrb[52].mxu0 %vm312_vm1, %v3594_v22  ;;  %v2384_v22 = vpop.permute.xlu0 %2383 }
 0xe21   : > { %2571 = vmatprep.mubr.f32.mxu0 %v3986_v5 }
 0xee7   : > { %v2325_v0 = vpop.f32.mrb[46].mxu0 }
 0xee8   : > { %v2327_v1 = vpop.f32.mrb[47].mxu0  ;;  %v2326_v3 = vadd.f32 %v2325_v0, %v2224_v2 }
 0xee9   : > { %v2328_v10 = vadd.f32 %v2327_v1, %v2224_v2 }
 0xeea   : > { %v2348_v15 = vmax.f32 %v2326_v3, 0.0 }
 0xeeb   : > { %v2331_v11 = vpop.f32.mrb[48].mxu0  ;;  %v2349_v17 = vmax.f32 %v2328_v10, 0.0 }
 0xeec   : > { %v2332_v12 = vadd.f32 %v2331_v11, %v2229_v4  ;;  %v2333_v13 = vpop.f32.mrb[49].mxu0 }
 0xeed   : > { %v2334_v14 = vadd.f32 %v2333_v13, %v2229_v4 }
 0xeee   : > { %v2350_v16 = vmax.f32 %v2332_v12, 0.0 }
 0xeef   : > { %v2351_v20 = vmax.f32 %v2334_v14, 0.0  ;;  %v2337_v8 = vpop.f32.mrb[50].mxu0 }
 0xef0   : > { %v3766_v21 = vpack.c.bf16 %v2350_v16, %v2348_v15  ;;  %v2339_v23 = vpop.f32.mrb[51].mxu0  ;;  %v2338_v26 = vadd.f32 %v2337_v8, %v2234_v24  ;;  %v3617_v16 = vld [vmem:[%s4842_s5 + $0x14] sm:$0xf] }
 0xef1   : > { %v3764_v25 = vpack.c.bf16 %v2351_v20, %v2349_v17  ;;  %v2340_v28 = vadd.f32 %v2339_v23, %v2234_v24  ;;  %v2502_v17 = vpop.permute.xlu1 %2501 }
 0xef2   : > { %v2352_v31 = vmax.f32 %v2338_v26, 0.0 }
 0xef3   : > { %v2343_v50 = vpop.f32.mrb[52].mxu0  ;;  %3765 = vmatprep.subr.bf16.mxu1 %v3764_v25  ;;  %v2353_v35 = vmax.f32 %v2340_v28, 0.0 }
 0xef4   : > { %v2344_v18 = vadd.f32 %v2343_v50, %v2239_v27  ;;  %v2345_v19 = vpop.f32.mrb[53].mxu0  ;;  %3767 = vmatpush1.bf16.msra.mxu1 %v3766_v21 }
 0xef5   : > { %v2346_v52 = vadd.f32 %v2345_v19, %v2239_v27 }
 0xef6   : > { %v2354_v34 = vmax.f32 %v2344_v18, 0.0 }
 0xef7   : > { %v2355_v36 = vmax.f32 %v2346_v52, 0.0 }
 0xef8   : > { %v3770_v37 = vpack.c.bf16 %v2354_v34, %v2352_v31 }
 0xef9   : > { %v3768_v38 = vpack.c.bf16 %v2355_v36, %v2353_v35 }
 0xefb   : > { %3769 = vmatprep.subr.bf16.mxu1 %v3768_v38 }
 0xefc   : > { %3771 = vmatpush1.bf16.msra.mxu1 %v3770_v37 }
 0xeff   : > { %3613 = vmatmul.mubr.msk.f32.vlgmr.msra.gmra.mrb[44].mxu1 %vm455_vm2, %v3605_v39 }
 0xf00   : > { %2468 = vmatprep.mubr.f32.mxu1 %v3986_v5 }
 0xf03   : > { %3614 = vmatmul.mubr.msk.f32.gmra.mrb[46].mxu1 %vm455_vm2, %v3606_v40  ;;  %v2609_v40 = vpop.permute.xlu0 %2608 }
 0xf04   : > { %2474 = vmatprep.mubr.f32.mxu1 %v3986_v5 }
 0xf07   : > { %3615 = vmatmul.mubr.msk.f32.gmra.mrb[48].mxu1 %vm455_vm2, %v3607_v41 }
 0xf08   : > { %2480 = vmatprep.mubr.f32.mxu1 %v3986_v5 }
 0xf0b   : > { %3616 = vmatmul.mubr.msk.f32.gmra.mrb[50].mxu1 %vm455_vm2, %v3608_v42  ;;  %v2614_v42 = vpop.permute.xlu1 %2613 }
 0xf0c   : > { %2708 = vmatprep.mubr.f32.mxu1 %v3986_v5 }
 0xfd2   : > { %v2464_v43 = vpop.f32.mrb[44].mxu1 }
 0xfd3   : > { %v2466_v44 = vpop.f32.mrb[45].mxu1  ;;  %v2465_v48 = vadd.f32 %v2464_v43, %v2369_v45 }
 0xfd4   : > { %v2467_v51 = vadd.f32 %v2466_v44, %v2369_v45 }
 0xfd5   : > { %v2487_v6 = vmax.f32 %v2465_v48, 0.0 }
 0xfd6   : > { %v2470_v53 = vpop.f32.mrb[46].mxu1  ;;  %v2488_v47 = vmax.f32 %v2467_v51, 0.0 }
 0xfd7   : > { %v2471_v54 = vadd.f32 %v2470_v53, %v2374_v49  ;;  %v2472_v55 = vpop.f32.mrb[47].mxu1 }
 0xfd8   : > { %v2473_v56 = vadd.f32 %v2472_v55, %v2374_v49 }
 0xfd9   : > { %v2489_v46 = vmax.f32 %v2471_v54, 0.0 }
 0xfda   : > { %v2490_v58 = vmax.f32 %v2473_v56, 0.0  ;;  %v2476_v59 = vpop.f32.mrb[48].mxu1 }
 0xfdb   : > { %v3774_v60 = vpack.c.bf16 %v2489_v46, %v2487_v6  ;;  %v2478_v61 = vpop.f32.mrb[49].mxu1  ;;  %v2477_v33 = vadd.f32 %v2476_v59, %v2379_v9 }
 0xfdc   : > { %v3772_v57 = vpack.c.bf16 %v2490_v58, %v2488_v47  ;;  %v2479_v0 = vadd.f32 %v2478_v61, %v2379_v9  ;;  %v2619_v47 = vpop.permute.xlu0 %2618 }
 0xfdd   : > { %v2491_v10 = vmax.f32 %v2477_v33, 0.0 }
 0xfde   : > { %v2482_v1 = vpop.f32.mrb[50].mxu1  ;;  %3773 = vmatprep.subr.bf16.mxu0 %v3772_v57  ;;  %v2492_v12 = vmax.f32 %v2479_v0, 0.0 }
 0xfdf   : > { %v2483_v2 = vadd.f32 %v2482_v1, %v2384_v22  ;;  %v2484_v3 = vpop.f32.mrb[51].mxu1  ;;  %3775 = vmatpush1.bf16.msra.mxu0 %v3774_v60  ;;  %v2624_v60 = vpop.permute.xlu1 %2623 }
 0xfe0   : > { %v2485_v4 = vadd.f32 %v2484_v3, %v2384_v22 }
 0xfe1   : > { %v2493_v11 = vmax.f32 %v2483_v2, 0.0 }
 0xfe2   : > { %v2494_v13 = vmax.f32 %v2485_v4, 0.0 }
 0xfe3   : > { %v3778_v14 = vpack.c.bf16 %v2493_v11, %v2491_v10  ;;  %v3634_v11 = vld [vmem:[%s4840_s3 + $0xc0] sm:$0xff] }
 0xfe4   : > { %v3776_v15 = vpack.c.bf16 %v2494_v13, %v2492_v12  ;;  %v3635_v12 = vld [vmem:[%s4840_s3 + $0xc8] sm:$0xff]  ;;  %v3636_v13 = vld [vmem:[%s4840_s3 + $0xd0] sm:$0xff] }
 0xfe6   : > { %3777 = vmatprep.subr.bf16.mxu0 %v3776_v15 }
 0xfe7   : > { %3779 = vmatpush1.bf16.msra.mxu0 %v3778_v14  ;;  %v3637_v14 = vld [vmem:[%s4840_s3 + $0xd8] sm:$0xff] }
 0xfea   : > { %3619 = vmatmul.mubr.msk.f32.vlgmr.msra.gmra.mrb[54].mxu0 %vm455_vm2, %v3617_v16 }
 0xfeb   : > { %2847 = vmatprep.mubr.f32.mxu0 %v3986_v5 }
0x10bd   : > { %v2573_v20 = vpop.f32.mrb[54].mxu0 }
0x10be   : > { %v2574_v8 = vadd.f32 %v2573_v20, %v2502_v17  ;;  %v2575_v21 = vpop.f32.mrb[55].mxu0 }
0x10bf   : > { %v2576_v23 = vadd.f32 %v2575_v21, %v2502_v17  ;;  %v2754_v17 = vpop.permute.xlu0 %2753 }
0x10c0   : > { %3897 = vtanh.f32 %v2574_v8  ;;  %v2588_v35 = vrot.slane %v2574_v8, 2  ;;  %v2759_v8 = vpop.permute.xlu1 %2758 }
0x10c1   : > { %3899 = vtanh.f32 %v2576_v23  ;;  %v2589_v34 = vrot.slane %v2576_v23, 2 }
0x10ca   : > { %v3898_v24 = vpop.eup %3897 }
0x10cb   : > { %v3900_v25 = vpop.eup %3899  ;;  %v2580_v26 = vmul.f32 1.442695, %v3898_v24  ;;  %v4663_v27 = vadd.f32 %v3898_v24, %v4602_v32  ;;  %v3620_v32 = vld [vmem:[%s4838_s1 + $0xc0] sm:$0xff] }
0x10cc   : > { %v2582_v28 = vmul.f32 1.442695, %v3900_v25  ;;  %v4666_v50 = vadd.f32 %v3900_v25, %v4605_v7  ;;  %v3623_v7 = vld [vmem:[%s4838_s1 + $0xd8] sm:$0xff] }
0x10cd   : > { %3901 = vpow2.f32 %v2580_v26 }
0x10ce   : > { %3903 = vpow2.f32 %v2582_v28 }
0x10d7   : > { %v3902_v18 = vpop.eup %3901 }
0x10d8   : > { %v3904_v19 = vpop.eup %3903  ;;  %v2584_v52 = vmul.f32 %v3902_v18, %v4550_v30  ;;  %v3622_v30 = vld [vmem:[%s4838_s1 + $0xd0] sm:$0xff] }
0x10d9   : > { %v2585_v31 = vmul.f32 %v3904_v19, %v4548_v29  ;;  %v3621_v29 = vld [vmem:[%s4838_s1 + $0xc8] sm:$0xff] }
0x10da   : > { %v4672_v37 = vadd.f32 %v2588_v35, %v2584_v52 }
0x10db   : > { %v4670_v36 = vadd.f32 %v2589_v34, %v2585_v31 }
0x10dd   : > { %3628 = vmatprep.subr.msk.mxu1 %vm325_vm0, %v4670_v36 }
0x10de   : > { %3629 = vmatpush1.msk.msra.mxu1 %vm325_vm0, %v4672_v37 }
0x10df   : > { %3630 = vmatmul.mubr.msk.f32.vlgmr.msra.gmra.mrb[52].mxu1 %vm312_vm1, %v3620_v32  ;;  %v2764_v32 = vpop.permute.xlu0 %2763 }
0x10e0   : > { %2714 = vmatprep.mubr.f32.mxu1 %v3986_v5 }
0x10e3   : > { %3631 = vmatmul.mubr.msk.f32.gmra.mrb[54].mxu1 %vm312_vm1, %v3621_v29 }
0x10e4   : > { %2720 = vmatprep.mubr.f32.mxu1 %v3986_v5 }
0x10e7   : > { %3632 = vmatmul.mubr.msk.f32.gmra.mrb[56].mxu1 %vm312_vm1, %v3622_v30 }
0x10e8   : > { %2726 = vmatprep.mubr.f32.mxu1 %v3986_v5 }
0x10eb   : > { %3633 = vmatmul.mubr.msk.f32.gmra.mrb[58].mxu1 %vm312_vm1, %v3623_v7  ;;  %v2769_v7 = vpop.permute.xlu1 %2768 }
0x10ec   : > { %2956 = vmatprep.mubr.f32.mxu1 %v3986_v5 }
0x11b2   : > { %v2710_v38 = vpop.f32.mrb[52].mxu1 }
0x11b3   : > { %v2712_v39 = vpop.f32.mrb[53].mxu1  ;;  %v2711_v41 = vadd.f32 %v2710_v38, %v2609_v40 }
0x11b4   : > { %v2713_v43 = vadd.f32 %v2712_v39, %v2609_v40 }
0x11b5   : > { %v2733_v51 = vmax.f32 %v2711_v41, 0.0 }
0x11b6   : > { %v2716_v44 = vpop.f32.mrb[54].mxu1  ;;  %v2734_v54 = vmax.f32 %v2713_v43, 0.0 }
0x11b7   : > { %v2717_v45 = vadd.f32 %v2716_v44, %v2614_v42  ;;  %v2718_v48 = vpop.f32.mrb[55].mxu1 }
0x11b8   : > { %v2719_v49 = vadd.f32 %v2718_v48, %v2614_v42 }
0x11b9   : > { %v2735_v53 = vmax.f32 %v2717_v45, 0.0 }
0x11ba   : > { %v2736_v55 = vmax.f32 %v2719_v49, 0.0  ;;  %v2722_v56 = vpop.f32.mrb[56].mxu1 }
0x11bb   : > { %v3782_v6 = vpack.c.bf16 %v2735_v53, %v2733_v51  ;;  %v2724_v46 = vpop.f32.mrb[57].mxu1  ;;  %v2723_v59 = vadd.f32 %v2722_v56, %v2619_v47  ;;  %v3646_v53 = vld [vmem:[%s4842_s5 + $0x18] sm:$0xf] }
0x11bc   : > { %v3780_v58 = vpack.c.bf16 %v2736_v55, %v2734_v54  ;;  %v2725_v61 = vadd.f32 %v2724_v46, %v2619_v47  ;;  %v2887_v54 = vpop.permute.xlu0 %2886 }
0x11bd   : > { %v2737_v0 = vmax.f32 %v2723_v59, 0.0 }
0x11be   : > { %v2728_v9 = vpop.f32.mrb[58].mxu1  ;;  %3781 = vmatprep.subr.bf16.mxu0 %v3780_v58  ;;  %v2738_v2 = vmax.f32 %v2725_v61, 0.0 }
0x11bf   : > { %v2729_v57 = vadd.f32 %v2728_v9, %v2624_v60  ;;  %v2730_v33 = vpop.f32.mrb[59].mxu1  ;;  %3783 = vmatpush1.bf16.msra.mxu0 %v3782_v6 }
0x11c0   : > { %v2731_v22 = vadd.f32 %v2730_v33, %v2624_v60 }
0x11c1   : > { %v2739_v1 = vmax.f32 %v2729_v57, 0.0 }
0x11c2   : > { %v2740_v3 = vmax.f32 %v2731_v22, 0.0 }
0x11c3   : > { %v3786_v4 = vpack.c.bf16 %v2739_v1, %v2737_v0 }
0x11c4   : > { %v3784_v10 = vpack.c.bf16 %v2740_v3, %v2738_v2 }
0x11c6   : > { %3785 = vmatprep.subr.bf16.mxu0 %v3784_v10 }
0x11c7   : > { %3787 = vmatpush1.bf16.msra.mxu0 %v3786_v4 }
0x11ca   : > { %3642 = vmatmul.mubr.msk.f32.vlgmr.msra.gmra.mrb[56].mxu0 %vm455_vm2, %v3634_v11 }
0x11cb   : > { %2853 = vmatprep.mubr.f32.mxu0 %v3986_v5 }
0x11ce   : > { %3643 = vmatmul.mubr.msk.f32.gmra.mrb[58].mxu0 %vm455_vm2, %v3635_v12  ;;  %v2994_v12 = vpop.permute.xlu1 %2993 }
0x11cf   : > { %2859 = vmatprep.mubr.f32.mxu0 %v3986_v5 }
0x11d2   : > { %3644 = vmatmul.mubr.msk.f32.gmra.mrb[60].mxu0 %vm455_vm2, %v3636_v13 }
0x11d3   : > { %2865 = vmatprep.mubr.f32.mxu0 %v3986_v5 }
0x11d6   : > { %3645 = vmatmul.mubr.msk.f32.gmra.mrb[62].mxu0 %vm455_vm2, %v3637_v14  ;;  %v2999_v14 = vpop.permute.xlu0 %2998 }
0x11d7   : > { %3232 = vmatprep.mubr.f32.mxu0 %v3986_v5 }
0x129d   : > { %v2849_v15 = vpop.f32.mrb[56].mxu0 }
0x129e   : > { %v2851_v16 = vpop.f32.mrb[57].mxu0  ;;  %v2850_v20 = vadd.f32 %v2849_v15, %v2754_v17 }
0x129f   : > { %v2852_v21 = vadd.f32 %v2851_v16, %v2754_v17 }
0x12a0   : > { %v2872_v28 = vmax.f32 %v2850_v20, 0.0 }
0x12a1   : > { %v2855_v23 = vpop.f32.mrb[58].mxu0  ;;  %v2873_v19 = vmax.f32 %v2852_v21, 0.0 }
0x12a2   : > { %v2856_v24 = vadd.f32 %v2855_v23, %v2759_v8  ;;  %v2857_v25 = vpop.f32.mrb[59].mxu0 }
0x12a3   : > { %v2858_v26 = vadd.f32 %v2857_v25, %v2759_v8 }
0x12a4   : > { %v2874_v18 = vmax.f32 %v2856_v24, 0.0 }
0x12a5   : > { %v2875_v52 = vmax.f32 %v2858_v26, 0.0  ;;  %v2861_v31 = vpop.f32.mrb[60].mxu0 }
0x12a6   : > { %v3790_v34 = vpack.c.bf16 %v2874_v18, %v2872_v28  ;;  %v2863_v35 = vpop.f32.mrb[61].mxu0  ;;  %v2862_v30 = vadd.f32 %v2861_v31, %v2764_v32 }
0x12a7   : > { %v3788_v29 = vpack.c.bf16 %v2875_v52, %v2873_v19  ;;  %v2864_v38 = vadd.f32 %v2863_v35, %v2764_v32  ;;  %v3004_v19 = vpop.permute.xlu1 %3003 }
0x12a8   : > { %v2876_v43 = vmax.f32 %v2862_v30, 0.0 }
0x12a9   : > { %v2867_v39 = vpop.f32.mrb[62].mxu0  ;;  %3789 = vmatprep.subr.bf16.mxu1 %v3788_v29  ;;  %v2877_v45 = vmax.f32 %v2864_v38, 0.0 }
0x12aa   : > { %v2868_v40 = vadd.f32 %v2867_v39, %v2769_v7  ;;  %v2869_v41 = vpop.f32.mrb[63].mxu0  ;;  %3791 = vmatpush1.bf16.msra.mxu1 %v3790_v34  ;;  %v3009_v34 = vpop.permute.xlu0 %3008 }
0x12ab   : > { %v2870_v42 = vadd.f32 %v2869_v41, %v2769_v7 }
0x12ac   : > { %v2878_v44 = vmax.f32 %v2868_v40, 0.0 }
0x12ad   : > { %v2879_v48 = vmax.f32 %v2870_v42, 0.0 }
0x12ae   : > { %v3794_v49 = vpack.c.bf16 %v2878_v44, %v2876_v43  ;;  %v3663_v44 = vld [vmem:[%s4840_s3 + $0xe0] sm:$0xff] }
0x12af   : > { %v3792_v51 = vpack.c.bf16 %v2879_v48, %v2877_v45  ;;  %v3664_v45 = vld [vmem:[%s4840_s3 + $0xe8] sm:$0xff]  ;;  %v3665_v48 = vld [vmem:[%s4840_s3 + $0xf0] sm:$0xff] }
0x12b1   : > { %3793 = vmatprep.subr.bf16.mxu1 %v3792_v51 }
0x12b2   : > { %3795 = vmatpush1.bf16.msra.mxu1 %v3794_v49  ;;  %v3666_v49 = vld [vmem:[%s4840_s3 + $0xf8] sm:$0xff] }
0x12b5   : > { %3648 = vmatmul.mubr.msk.f32.vlgmr.msra.gmra.mrb[60].mxu1 %vm455_vm2, %v3646_v53 }
0x12b6   : > { %3093 = vmatprep.mubr.f32.mxu1 %v3986_v5 }
0x1388   : > { %v2958_v55 = vpop.f32.mrb[60].mxu1 }
0x1389   : > { %v2959_v56 = vadd.f32 %v2958_v55, %v2887_v54  ;;  %v2960_v6 = vpop.f32.mrb[61].mxu1 }
0x138a   : > { %v2961_v46 = vadd.f32 %v2960_v6, %v2887_v54  ;;  %v3139_v54 = vpop.permute.xlu1 %3138 }
0x138b   : > { %3905 = vtanh.f32 %v2959_v56  ;;  %v2973_v2 = vrot.slane %v2959_v56, 2  ;;  %v3144_v56 = vpop.permute.xlu0 %3143 }
0x138c   : > { %3907 = vtanh.f32 %v2961_v46  ;;  %v2974_v1 = vrot.slane %v2961_v46, 2 }
0x1395   : > { %v3906_v47 = vpop.eup %3905 }
0x1396   : > { %v3908_v58 = vpop.eup %3907  ;;  %v2965_v59 = vmul.f32 1.442695, %v3906_v47  ;;  %v4724_v60 = vadd.f32 %v3906_v47, %v4663_v27  ;;  %v3649_v27 = vld [vmem:[%s4838_s1 + $0xe0] sm:$0xff] }
0x1397   : > { %v2967_v61 = vmul.f32 1.442695, %v3908_v58  ;;  %v4727_v9 = vadd.f32 %v3908_v58, %v4666_v50  ;;  %v3652_v50 = vld [vmem:[%s4838_s1 + $0xf8] sm:$0xff] }
0x1398   : > { %3909 = vpow2.f32 %v2965_v59 }
0x1399   : > { %3911 = vpow2.f32 %v2967_v61 }
0x13a2   : > { %v3910_v57 = vpop.eup %3909 }
0x13a3   : > { %v3912_v33 = vpop.eup %3911  ;;  %v2969_v22 = vmul.f32 %v3910_v57, %v4611_v63  ;;  %v3651_v63 = vld [vmem:[%s4838_s1 + $0xf0] sm:$0xff] }
0x13a4   : > { %v2970_v0 = vmul.f32 %v3912_v33, %v4609_v62  ;;  %v3650_v62 = vld [vmem:[%s4838_s1 + $0xe8] sm:$0xff] }
0x13a5   : > { %v4733_v4 = vadd.f32 %v2973_v2, %v2969_v22  ;;  %v3149_v2 = vpop.permute.xlu1 %3148 }
0x13a6   : > { %v4731_v3 = vadd.f32 %v2974_v1, %v2970_v0 }
0x13a8   : > { %3657 = vmatprep.subr.msk.mxu1 %vm325_vm0, %v4731_v3 }
0x13a9   : > { %3658 = vmatpush1.msk.msra.mxu1 %vm325_vm0, %v4733_v4 }
0x13aa   : > { %3659 = vmatmul.mubr.msk.f32.vlgmr.msra.gmra.mrb[62].mxu1 %vm312_vm1, %v3649_v27 }
0x13ab   : > { %3099 = vmatprep.mubr.f32.mxu1 %v3986_v5 }
0x13ae   : > { %3660 = vmatmul.mubr.msk.f32.gmra.mrb[64].mxu1 %vm312_vm1, %v3650_v62 }
0x13af   : > { %3105 = vmatprep.mubr.f32.mxu1 %v3986_v5 }
0x13b2   : > { %3661 = vmatmul.mubr.msk.f32.gmra.mrb[66].mxu1 %vm312_vm1, %v3651_v63  ;;  %v3154_v63 = vpop.permute.xlu0 %3153 }
0x13b3   : > { %3111 = vmatprep.mubr.f32.mxu1 %v3986_v5 }
0x13b6   : > { %3662 = vmatmul.mubr.msk.f32.gmra.mrb[68].mxu1 %vm312_vm1, %v3652_v50 }
0x13b7   : > { %3341 = vmatprep.mubr.f32.mxu1 %v3986_v5 }
0x147d   : > { %v3095_v10 = vpop.f32.mrb[62].mxu1 }
0x147e   : > { %v3097_v11 = vpop.f32.mrb[63].mxu1  ;;  %v3096_v13 = vadd.f32 %v3095_v10, %v2994_v12 }
0x147f   : > { %v3098_v15 = vadd.f32 %v3097_v11, %v2994_v12 }
0x1480   : > { %v3118_v21 = vmax.f32 %v3096_v13, 0.0 }
0x1481   : > { %v3101_v16 = vpop.f32.mrb[64].mxu1  ;;  %v3119_v24 = vmax.f32 %v3098_v15, 0.0 }
0x1482   : > { %v3102_v17 = vadd.f32 %v3101_v16, %v2999_v14  ;;  %v3103_v20 = vpop.f32.mrb[65].mxu1 }
0x1483   : > { %v3104_v8 = vadd.f32 %v3103_v20, %v2999_v14 }
0x1484   : > { %v3120_v23 = vmax.f32 %v3102_v17, 0.0 }
0x1485   : > { %v3121_v25 = vmax.f32 %v3104_v8, 0.0  ;;  %v3107_v26 = vpop.f32.mrb[66].mxu1 }
0x1486   : > { %v3798_v28 = vpack.c.bf16 %v3120_v23, %v3118_v21  ;;  %v3109_v18 = vpop.f32.mrb[67].mxu1  ;;  %v3108_v31 = vadd.f32 %v3107_v26, %v3004_v19  ;;  %v3675_v21 = vld [vmem:[%s4842_s5 + $0x1c] sm:$0xf]  ;;  %v3272_v23 = vpop.permute.xlu1 %3271 }
0x1487   : > { %v3796_v52 = vpack.c.bf16 %v3121_v25, %v3119_v24  ;;  %v3110_v35 = vadd.f32 %v3109_v18, %v3004_v19 }
0x1488   : > { %v3122_v38 = vmax.f32 %v3108_v31, 0.0 }
0x1489   : > { %v3113_v32 = vpop.f32.mrb[68].mxu1  ;;  %3797 = vmatprep.subr.bf16.mxu0 %v3796_v52  ;;  %v3123_v40 = vmax.f32 %v3110_v35, 0.0 }
0x148a   : > { %v3114_v29 = vadd.f32 %v3113_v32, %v3009_v34  ;;  %v3115_v30 = vpop.f32.mrb[69].mxu1  ;;  %3799 = vmatpush1.bf16.msra.mxu0 %v3798_v28 }
0x148b   : > { %v3116_v7 = vadd.f32 %v3115_v30, %v3009_v34 }
0x148c   : > { %v3124_v39 = vmax.f32 %v3114_v29, 0.0 }
0x148d   : > { %v3125_v41 = vmax.f32 %v3116_v7, 0.0 }
0x148e   : > { %v3802_v42 = vpack.c.bf16 %v3124_v39, %v3122_v38 }
0x148f   : > { %v3800_v43 = vpack.c.bf16 %v3125_v41, %v3123_v40  ;;  %v3366_v40 = vrot.slane %v4733_v4, 6 }
0x1491   : > { %3801 = vmatprep.subr.bf16.mxu0 %v3800_v43 }
0x1492   : > { %3803 = vmatpush1.bf16.msra.mxu0 %v3802_v42 }
0x1495   : > { %3671 = vmatmul.mubr.msk.f32.vlgmr.msra.gmra.mrb[64].mxu0 %vm455_vm2, %v3663_v44 }
0x1496   : > { %3238 = vmatprep.mubr.f32.mxu0 %v3986_v5 }
0x1499   : > { %3672 = vmatmul.mubr.msk.f32.gmra.mrb[66].mxu0 %vm455_vm2, %v3664_v45 }
0x149a   : > { %3244 = vmatprep.mubr.f32.mxu0 %v3986_v5 }
0x149d   : > { %3673 = vmatmul.mubr.msk.f32.gmra.mrb[68].mxu0 %vm455_vm2, %v3665_v48 }
0x149e   : > { %3250 = vmatprep.mubr.f32.mxu0 %v3986_v5 }
0x14a1   : > { %3674 = vmatmul.mubr.msk.f32.gmra.mrb[70].mxu0 %vm455_vm2, %v3666_v49 }
0x1568   : > { %v3234_v51 = vpop.f32.mrb[64].mxu0 }
0x1569   : > { %v3236_v53 = vpop.f32.mrb[65].mxu0  ;;  %v3235_v55 = vadd.f32 %v3234_v51, %v3139_v54 }
0x156a   : > { %v3237_v6 = vadd.f32 %v3236_v53, %v3139_v54 }
0x156b   : > { %v3257_v61 = vmax.f32 %v3235_v55, 0.0 }
0x156c   : > { %v3240_v46 = vpop.f32.mrb[66].mxu0  ;;  %v3258_v33 = vmax.f32 %v3237_v6, 0.0 }
0x156d   : > { %v3241_v47 = vadd.f32 %v3240_v46, %v3144_v56  ;;  %v3242_v58 = vpop.f32.mrb[67].mxu0 }
0x156e   : > { %v3243_v59 = vadd.f32 %v3242_v58, %v3144_v56 }
0x156f   : > { %v3259_v57 = vmax.f32 %v3241_v47, 0.0 }
0x1570   : > { %v3260_v5 = vmax.f32 %v3243_v59, 0.0  ;;  %v3246_v22 = vpop.f32.mrb[68].mxu0 }
0x1571   : > { %v3806_v0 = vpack.c.bf16 %v3259_v57, %v3257_v61  ;;  %v3248_v1 = vpop.f32.mrb[69].mxu0  ;;  %v3247_v62 = vadd.f32 %v3246_v22, %v3149_v2 }
0x1572   : > { %v3804_v27 = vpack.c.bf16 %v3260_v5, %v3258_v33  ;;  %v3249_v50 = vadd.f32 %v3248_v1, %v3149_v2 }
0x1573   : > { %v3261_v14 = vmax.f32 %v3247_v62, 0.0 }
0x1574   : > { %v3252_v10 = vpop.f32.mrb[70].mxu0  ;;  %3805 = vmatprep.subr.bf16.mxu1 %v3804_v27  ;;  %v3262_v16 = vmax.f32 %v3249_v50, 0.0 }
0x1575   : > { %v3253_v11 = vadd.f32 %v3252_v10, %v3154_v63  ;;  %v3254_v12 = vpop.f32.mrb[71].mxu0  ;;  %3807 = vmatpush1.bf16.msra.mxu1 %v3806_v0 }
0x1576   : > { %v3255_v13 = vadd.f32 %v3254_v12, %v3154_v63 }
0x1577   : > { %v3263_v15 = vmax.f32 %v3253_v11, 0.0 }
0x1578   : > { %v3264_v17 = vmax.f32 %v3255_v13, 0.0 }
0x1579   : > { %v3810_v20 = vpack.c.bf16 %v3263_v15, %v3261_v14 }
0x157a   : > { %v3808_v8 = vpack.c.bf16 %v3264_v17, %v3262_v16 }
0x157c   : > { %3809 = vmatprep.subr.bf16.mxu1 %v3808_v8 }
0x157d   : > { %3811 = vmatpush1.bf16.msra.mxu1 %v3810_v20 }
0x1580   : > { %3677 = vmatmul.mubr.msk.f32.vlgmr.msra.gmra.mrb[70].mxu1 %vm455_vm2, %v3675_v21 }
0x1653   : > { %v3343_v24 = vpop.f32.mrb[70].mxu1 }
0x1654   : > { %v3344_v25 = vadd.f32 %v3343_v24, %v3272_v23  ;;  %v3345_v26 = vpop.f32.mrb[71].mxu1 }
0x1655   : > { %v3346_v28 = vadd.f32 %v3345_v26, %v3272_v23 }
0x1656   : > { %3913 = vtanh.f32 %v3344_v25  ;;  %v3358_v7 = vrot.slane %v3344_v25, 2 }
0x1657   : > { %3915 = vtanh.f32 %v3346_v28  ;;  %v3359_v39 = vrot.slane %v3346_v28, 2 }
0x1660   : > { %v3914_v18 = vpop.eup %3913 }
0x1661   : > { %v3916_v19 = vpop.eup %3915  ;;  %v3350_v52 = vmul.f32 1.442695, %v3914_v18  ;;  %v3364_v31 = vadd.f32 %v3914_v18, %v4724_v60  ;;  %v3367_v60 = vrot.slane %v4731_v3, 6 }
0x1662   : > { %v3352_v34 = vmul.f32 1.442695, %v3916_v19  ;;  %v3365_v35 = vadd.f32 %v3916_v19, %v4727_v9 }
0x1663   : > { %3917 = vpow2.f32 %v3350_v52  ;;  %v3372_v42 = vrot.slane %v3364_v31, 4 }
0x1664   : > { %3919 = vpow2.f32 %v3352_v34  ;;  %v3373_v43 = vrot.slane %v3365_v35, 4 }
0x166d   : > { %v3918_v32 = vpop.eup %3917 }
0x166e   : > { %v3920_v29 = vpop.eup %3919  ;;  %v3354_v30 = vmul.f32 %v3918_v32, %v4672_v37 }
0x166f   : > { %v3355_v38 = vmul.f32 %v3920_v29, %v4670_v36 }
0x1670   : > { %v3362_v41 = vadd.f32 %v3358_v7, %v3354_v30 }
0x1671   : > { %v3363_v9 = vadd.f32 %v3359_v39, %v3355_v38 }
0x1672   : > { %v3376_v44 = vsel %vm325_vm0, %v3362_v41, %v3366_v40 }
0x1673   : > { %v3377_v37 = vsel %vm325_vm0, %v3363_v9, %v3367_v60  ;;  %v3379_v45 = vsel %vm3378_vm3, %v3376_v44, %v3372_v42 }
0x1674   : > { %v3380_v36 = vsel %vm3378_vm3, %v3377_v37, %v3373_v43  ;;  %3381 = vst [vmem:[%s272_s9] sm:$0x3f] %v3379_v45 }
0x1675   : > { %3382 = vst [vmem:[%s272_s9 + $0x8] sm:$0x3f] %v3380_v36 }
0x1676   : > { %3934 = shalt.err (!%p3931_p3)
}
0x1677   : > { %s3935_s21 = scalar_lea.hbm %s4795_s16, 256  ;;  %s3939_s29 = scalar_lea.hbm %s4844_s7, 512 }
0x1678   : > { %p3936_p4 = scmp.ne.s32.totalorder %s4795_s16, %s3935_s21  ;;  %p3940_p9 = scmp.lt.u32.totalorder %s4795_s16, %s4844_s7 }
0x1679   : > { %p3941_p10 = scmp.lt.u32.totalorder %s3939_s29, %s3935_s21  ;;  %p3943_p12 = scmp.lt.u32.totalorder %s3935_s21, %s4795_s16 }
0x167a   : > { %p3937_p7 = pnand %p3936_p4, %p4066_p5 }
0x167b   : > { %p3942_p11 = por %p3941_p10, %p3940_p9 }
0x167c   : > { %p3938_p8 = pneg %p3937_p7 }
0x167d   : > { %p3944_p13 = por %p3943_p12, %p3942_p11 }
0x167f   : > { %p3945_p0 = pnand %p3944_p13, %p3938_p8 }
0x1681   : > { %3948 = shalt.err (!%p3945_p0)
}
0x1682   : > { %3812 = dma.vmem_to_hbm [thread:$0]  (%p4066_p5), %s4797_s13, 256, %s4795_s16, %s3384_s28  }
0x1683 PF: > { %p3818_p1 = scmp.ge.s32.totalorder %s3983_s27, 2  ;;  %s3410_s14 = sand.u32 1, %s3971_s24  }
0x1684   : > { %s3411_s15 = scalar_lea.sflag [#allocation3], %s3410_s14 }
0x1685   : > { %p3815_p2 = pnand %p3818_p1, %p4070_p6 }
0x1687   : > { %3966 = dma.done.wait (!%p3815_p2), %s3411_s15, 256  }
0x1688   : > { %3968 = vsyncadd (!%p3815_p2), %s3411_s15, 4294967040  ;;  %p17_p3 = scmp.ge.s32.totalorder %s4053_s30, 4   ;;  %s4847_s24 = smov %s3975_s25 }
0x1689   : > { %s4848_s25 = smov %s3979_s26  ;;  %s4849_s26 = smov %s4064_s10 }
0x168a   : > { %s4850_s27 = smov %s4053_s30  ;;  %19 = sbr.rel (!%p17_p3) target bundleno = 3 (0x3), region = 125 }
0x1691   :  { %3416 = vsyncpa [#allocation3], 1 }
0x1692   :  { %3418 = vsyncpa [#allocation3 + $0x1], 1 }

</bundles_post_ra>
